<compile_context>
chip_gen: v7x
topology: tpu7x:2x2x1
jax: 0.10.0
libtpu: 0.0.40
codegen_flags: <defaults>
</compile_context>

<pallas_src>
import functools

import jax
import jax.numpy as jnp
from jax.experimental import pallas as pl
from jax.experimental.pallas import tpu as pltpu

_MXU_DTYPE = jnp.bfloat16  # MXU operand dtype (f32 accumulation everywhere)


# -----------------------------------------------------------------------------
# Fused kernel: LSTM over time + FC + two RGCN layers, all resident in VMEM.
# -----------------------------------------------------------------------------
def _fused_kernel(x_ref,      # [T*N, D]     time-major flattened seqs  (bf16)
                  wih_ref,    # [D, 4H]      gate order (i, f, o, g)    (bf16)
                  whh_ref,    # [H, 4H]      gate order (i, f, o, g)    (bf16)
                  b_ref,      # [1, 4H]      b_ih + b_hh, reordered     (f32)
                  wfc_ref,    # [H, H]                                  (bf16)
                  bfc_ref,    # [1, H]                                  (f32)
                  a_ref,      # [N, R*N]     normalized adjacency       (bf16)
                  w1_ref,     # [H, (R+1)*H] [W_root | W_1..W_R]        (bf16)
                  b1_ref,     # [1, H]                                  (f32)
                  w2_ref,     # [H, (R+1)*O] [W_root | W_1..W_R]        (bf16)
                  b2_ref,     # [1, O]                                  (f32)
                  out_ref,    # [N, O]                                  (f32)
                  *, seq_len, num_nodes, hidden_dim, num_relations):
    T, N, H, R = seq_len, num_nodes, hidden_dim, num_relations
    O = out_ref.shape[1]
    mxu = _MXU_DTYPE

    # ---------------- LSTM encoder ----------------
    # Hoisted input projection for ALL timesteps (one well-shaped matmul),
    # bias broadcast folded in once (not re-materialized per step).
    gates_x = (jnp.dot(x_ref[...], wih_ref[...],
                       preferred_element_type=jnp.float32)
               + b_ref[...])                                   # [T*N, 4H] f32

    whh = whh_ref[...]
    h = jnp.zeros((N, H), jnp.float32)
    c = jnp.zeros((N, H), jnp.float32)

    for t in range(T):  # fully unrolled: T is static and small
        gates = gates_x[t * N:(t + 1) * N, :] + jnp.dot(
            h.astype(mxu), whh, preferred_element_type=jnp.float32)
        # gate layout (i, f, o | g): one contiguous sigmoid, one tanh
        sig = jax.nn.sigmoid(gates[:, :3 * H])
        g_g = jnp.tanh(gates[:, 3 * H:])
        i_g = sig[:, :H]
        f_g = sig[:, H:2 * H]
        o_g = sig[:, 2 * H:3 * H]
        c = f_g * c + i_g * g_g
        h = o_g * jnp.tanh(c)

    # Final FC on last hidden state.
    feats = (jnp.dot(h.astype(mxu), wfc_ref[...],
                     preferred_element_type=jnp.float32)
             + bfc_ref[...])                                   # [N, H] f32

    a = a_ref[...]                                             # [N, R*N] bf16

    # ---------------- RGCN layer 1 (+ ReLU) ----------------
    # One projection matmul covering root + all relations.
    xw1 = jnp.dot(feats.astype(mxu), w1_ref[...],
                  preferred_element_type=jnp.float32)          # [N, (R+1)*H]
    rel1 = jnp.concatenate(
        [xw1[:, (1 + r) * H:(2 + r) * H] for r in range(R)],
        axis=0).astype(mxu)                                    # [R*N, H]
    h1 = (xw1[:, :H] + b1_ref[...]
          + jnp.dot(a, rel1, preferred_element_type=jnp.float32))
    h1 = jnp.maximum(h1, 0.0)
    # TODO(synk): dropout(p=0.5) treated as identity (eval mode).

    # ---------------- RGCN layer 2 ----------------
    xw2 = jnp.dot(h1.astype(mxu), w2_ref[...],
                  preferred_element_type=jnp.float32)          # [N, (R+1)*O]
    rel2 = jnp.concatenate(
        [xw2[:, (1 + r) * O:(2 + r) * O] for r in range(R)],
        axis=0).astype(mxu)                                    # [R*N, O]
    out_ref[...] = (xw2[:, :O] + b2_ref[...]
                    + jnp.dot(a, rel2, preferred_element_type=jnp.float32))


# -----------------------------------------------------------------------------
# Wrapper: single pallas_call, everything whole-array-resident in VMEM.
# -----------------------------------------------------------------------------
def lstm_rgcn_forward(prepared, node_sequences, adjacency_bf16):
    N, T, D = node_sequences.shape
    H = prepared["whh"].shape[0]
    O = prepared["b2"].shape[1]
    R = adjacency_bf16.shape[1] // N

    # time-major flatten: row index = t*N + n
    x_flat = (jnp.transpose(node_sequences, (1, 0, 2))
              .reshape(T * N, D).astype(_MXU_DTYPE))

    vmem = pl.BlockSpec(memory_space=pltpu.MemorySpace.VMEM)
    kernel = functools.partial(_fused_kernel, seq_len=T, num_nodes=N,
                               hidden_dim=H, num_relations=R)
    return pl.pallas_call(
        kernel,
        out_shape=jax.ShapeDtypeStruct((N, O), jnp.float32),
        in_specs=[vmem] * 11,
        out_specs=vmem,
        compiler_params=pltpu.CompilerParams(
            vmem_limit_bytes=32 * 1024 * 1024),
    )(x_flat, prepared["wih"], prepared["whh"], prepared["b"],
      prepared["wfc"], prepared["bfc"], adjacency_bf16,
      prepared["w1"], prepared["b1"], prepared["w2"], prepared["b2"])


# -----------------------------------------------------------------------------
# Glue (hoisted out of the per-forward path).
# -----------------------------------------------------------------------------
def build_adjacency(edge_index, edge_type, num_nodes, num_relations):
    """Row-normalized per-relation adjacency as one [N, R*N] f32 matrix.

    A[i, r*N + j] = 1/|N_r(i)| if there is an edge j->i of relation r.
    Built with dense one-hot matmuls (no scatter).
    """
    src = edge_index[0]
    dst = edge_index[1]
    num_edges = src.shape[0]
    nodes = jnp.arange(num_nodes)
    rels = jnp.arange(num_relations)

    d_r = (edge_type[:, None] == rels[None, :]).astype(jnp.float32)   # [E, R]
    d_i = (dst[:, None] == nodes[None, :]).astype(jnp.float32)        # [E, N]
    s_j = (src[:, None] == nodes[None, :]).astype(jnp.float32)        # [E, N]

    dr_i = (d_r[:, :, None] * d_i[:, None, :]).reshape(
        num_edges, num_relations * num_nodes)                         # [E, R*N]
    adj = (dr_i.T @ s_j).reshape(num_relations, num_nodes, num_nodes)  # adj[r,i,j]

    deg = adj.sum(axis=-1, keepdims=True)                # per-relation in-degree
    adj = adj / jnp.maximum(deg, 1.0)                    # mean aggregation

    # relation-major horizontal layout: [N, R*N]
    return jnp.transpose(adj, (1, 0, 2)).reshape(
        num_nodes, num_relations * num_nodes)


def _reorder_gates(w):
    """Reorder the 4H gate axis from PyTorch (i, f, g, o) to (i, f, o, g)."""
    H = w.shape[-1] // 4
    i, f, g, o = (w[..., k * H:(k + 1) * H] for k in range(4))
    return jnp.concatenate([i, f, o, g], axis=-1)


def prepare_params(params):
    """One-time layout prep: gate reorder, RGCN weight concat, bf16 casts."""
    R = params["conv1_wrel"].shape[0]

    def cat_rgcn(wroot, wrel):
        return jnp.concatenate([wroot] + [wrel[r] for r in range(R)], axis=1)

    return {
        "wih": _reorder_gates(params["lstm_wih"]).astype(_MXU_DTYPE),
        "whh": _reorder_gates(params["lstm_whh"]).astype(_MXU_DTYPE),
        "b": _reorder_gates(params["lstm_b"]).astype(jnp.float32),
        "wfc": params["fc_w"].astype(_MXU_DTYPE),
        "bfc": params["fc_b"].astype(jnp.float32),
        "w1": cat_rgcn(params["conv1_wroot"],
                       params["conv1_wrel"]).astype(_MXU_DTYPE),
        "b1": params["conv1_b"].astype(jnp.float32),
        "w2": cat_rgcn(params["conv2_wroot"],
                       params["conv2_wrel"]).astype(_MXU_DTYPE),
        "b2": params["conv2_b"].astype(jnp.float32),
    }


# -----------------------------------------------------------------------------
# Pure-JAX f32 reference (PyTorch gate order (i, f, g, o)) for a sanity check.
# -----------------------------------------------------------------------------
def reference_forward(params, node_sequences, adjacency_f32, num_relations):
    N, T, D = node_sequences.shape
    H = params["lstm_whh"].shape[0]
    wih, whh, b = params["lstm_wih"], params["lstm_whh"], params["lstm_b"][0]
    h = jnp.zeros((N, H), jnp.float32)
    c = jnp.zeros((N, H), jnp.float32)
    for t in range(T):
        g = node_sequences[:, t, :] @ wih + h @ whh + b
        i_g = jax.nn.sigmoid(g[:, :H])
        f_g = jax.nn.sigmoid(g[:, H:2 * H])
        g_g = jnp.tanh(g[:, 2 * H:3 * H])
        o_g = jax.nn.sigmoid(g[:, 3 * H:])
        c = f_g * c + i_g * g_g
        h = o_g * jnp.tanh(c)
    feats = h @ params["fc_w"] + params["fc_b"][0]

    def rgcn_layer(x, wroot, wrel, bias):
        out = x @ wroot + bias[0]
        for r in range(num_relations):
            a_r = adjacency_f32[:, r * N:(r + 1) * N]
            out = out + a_r @ (x @ wrel[r])
        return out

    h1 = jnp.maximum(rgcn_layer(feats, params["conv1_wroot"],
                                params["conv1_wrel"], params["conv1_b"]), 0.0)
    return rgcn_layer(h1, params["conv2_wroot"],
                      params["conv2_wrel"], params["conv2_b"])


# -----------------------------------------------------------------------------
# Deterministic parameter init (shapes follow the PyTorch module's __init__;
# matrices stored transposed [in, out]; LSTM gates in PyTorch (i,f,g,o) order).
# -----------------------------------------------------------------------------
def init_params(key, input_dim, hidden_dim, output_dim, num_relations):
    ks = jax.random.split(key, 12)
    s = 1.0 / jnp.sqrt(hidden_dim)

    def u(k, shape, scale):
        return jax.random.uniform(k, shape, jnp.float32, -scale, scale)

    return {
        "lstm_wih": u(ks[0], (input_dim, 4 * hidden_dim), s),
        "lstm_whh": u(ks[1], (hidden_dim, 4 * hidden_dim), s),
        "lstm_b": u(ks[2], (1, 4 * hidden_dim), s),     # b_ih + b_hh folded
        "fc_w": u(ks[3], (hidden_dim, hidden_dim), s),
        "fc_b": u(ks[4], (1, hidden_dim), s),
        "conv1_wrel": u(ks[5], (num_relations, hidden_dim, hidden_dim), s),
        "conv1_wroot": u(ks[6], (hidden_dim, hidden_dim), s),
        "conv1_b": u(ks[7], (1, hidden_dim), s),
        "conv2_wrel": u(ks[8], (num_relations, hidden_dim, output_dim), s),
        "conv2_wroot": u(ks[9], (hidden_dim, output_dim), s),
        "conv2_b": u(ks[10], (1, output_dim), s),
    }


if __name__ == "__main__":
    input_dim, hidden_dim, output_dim, num_relations = 8, 32, 16, 3
    num_nodes, seq_len, num_edges = 16, 8, 40

    key = jax.random.PRNGKey(0)
    k_param, k_seq, k_src, k_dst, k_rel = jax.random.split(key, 5)

    params = init_params(k_param, input_dim, hidden_dim, output_dim,
                         num_relations)
    prepared = prepare_params(params)

    node_sequences = jax.random.normal(
        k_seq, (num_nodes, seq_len, input_dim), jnp.float32)
    src = jax.random.randint(k_src, (num_edges,), 0, num_nodes, jnp.int32)
    dst = jax.random.randint(k_dst, (num_edges,), 0, num_nodes, jnp.int32)
    edge_index = jnp.stack([src, dst], axis=0)                  # [2, E]
    edge_type = jax.random.randint(k_rel, (num_edges,), 0, num_relations,
                                   jnp.int32)                   # [E]

    # Adjacency built once per graph (hoisted out of the forward path).
    adjacency_f32 = build_adjacency(edge_index, edge_type, num_nodes,
                                    num_relations)
    adjacency_bf16 = adjacency_f32.astype(_MXU_DTYPE)

    out = lstm_rgcn_forward(prepared, node_sequences, adjacency_bf16)
    out = jax.block_until_ready(out)
    assert out.shape == (num_nodes, output_dim)
    assert bool(jnp.all(jnp.isfinite(out)))

    # Loose tolerance: kernel runs MXU operands in bf16 (f32 accumulation).
    ref = reference_forward(params, node_sequences, adjacency_f32,
                            num_relations)
    assert bool(jnp.allclose(out, ref, atol=2e-1, rtol=1e-1)), (
        f"max abs err {float(jnp.max(jnp.abs(out - ref))):.4f}")

    print("KERNEL_OK")
</pallas_src>

<mosaic_0001>
module attributes {stable_mosaic.version = 11 : i64} {
  func.func @_fused_kernel(%arg0: memref<128x8xbf16, #tpu.memory_space<vmem>>, %arg1: memref<8x128xbf16, #tpu.memory_space<vmem>>, %arg2: memref<32x128xbf16, #tpu.memory_space<vmem>>, %arg3: memref<1x128xf32, #tpu.memory_space<vmem>>, %arg4: memref<32x32xbf16, #tpu.memory_space<vmem>>, %arg5: memref<1x32xf32, #tpu.memory_space<vmem>>, %arg6: memref<16x48xbf16, #tpu.memory_space<vmem>>, %arg7: memref<32x128xbf16, #tpu.memory_space<vmem>>, %arg8: memref<1x32xf32, #tpu.memory_space<vmem>>, %arg9: memref<32x64xbf16, #tpu.memory_space<vmem>>, %arg10: memref<1x16xf32, #tpu.memory_space<vmem>>, %arg11: memref<16x16xf32, #tpu.memory_space<vmem>>) attributes {dimension_semantics = [], scalar_prefetch = 0 : i64, scratch_operands = 0 : i64, tpu.core_type = #tpu.core_type<tc>} {
    %c0 = arith.constant 0 : index
    %c0_0 = arith.constant 0 : index
    %0 = vector.load %arg0[%c0, %c0_0] : memref<128x8xbf16, #tpu.memory_space<vmem>>, vector<128x8xbf16>
    %c0_1 = arith.constant 0 : index
    %c0_2 = arith.constant 0 : index
    %1 = vector.load %arg1[%c0_1, %c0_2] : memref<8x128xbf16, #tpu.memory_space<vmem>>, vector<8x128xbf16>
    %cst = arith.constant dense<0.000000e+00> : vector<128x128xf32>
    %2 = tpu.matmul %0, %1, %cst {dimension_numbers = #tpu.dot_dimension_numbers<[1], [0], [0], [1], [0, 0, 1, 1], [], []>} : vector<128x8xbf16>, vector<8x128xbf16>, vector<128x128xf32> -> vector<128x128xf32>
    %c0_3 = arith.constant 0 : index
    %c0_4 = arith.constant 0 : index
    %3 = vector.load %arg3[%c0_3, %c0_4] : memref<1x128xf32, #tpu.memory_space<vmem>>, vector<1x128xf32>
    %4 = vector.broadcast %3 : vector<1x128xf32> to vector<128x128xf32>
    %5 = arith.addf %2, %4 : vector<128x128xf32>
    %c0_5 = arith.constant 0 : index
    %c0_6 = arith.constant 0 : index
    %6 = vector.load %arg2[%c0_5, %c0_6] : memref<32x128xbf16, #tpu.memory_space<vmem>>, vector<32x128xbf16>
    %cst_7 = arith.constant 0.000000e+00 : f32
    %7 = vector.broadcast %cst_7 : f32 to vector<16x32xf32>
    %cst_8 = arith.constant 0.000000e+00 : f32
    %8 = vector.broadcast %cst_8 : f32 to vector<16x32xf32>
    %9 = vector.extract_strided_slice %5 {offsets = [0, 0], sizes = [16, 128], strides = [1, 1]} : vector<128x128xf32> to vector<16x128xf32>
    %10 = arith.truncf %7 : vector<16x32xf32> to vector<16x32xbf16>
    %cst_9 = arith.constant dense<0.000000e+00> : vector<16x128xf32>
    %11 = tpu.matmul %10, %6, %cst_9 {dimension_numbers = #tpu.dot_dimension_numbers<[1], [0], [0], [1], [0, 0, 1, 1], [], []>} : vector<16x32xbf16>, vector<32x128xbf16>, vector<16x128xf32> -> vector<16x128xf32>
    %12 = arith.addf %9, %11 : vector<16x128xf32>
    %13 = vector.extract_strided_slice %12 {offsets = [0, 0], sizes = [16, 96], strides = [1, 1]} : vector<16x128xf32> to vector<16x96xf32>
    %14 = arith.negf %13 : vector<16x96xf32>
    %15 = math.exp %14 : vector<16x96xf32>
    %cst_10 = arith.constant 1.000000e+00 : f32
    %16 = vector.broadcast %cst_10 : f32 to vector<16x96xf32>
    %17 = arith.addf %16, %15 : vector<16x96xf32>
    %18 = arith.divf %16, %17 : vector<16x96xf32>
    %19 = vector.extract_strided_slice %12 {offsets = [0, 96], sizes = [16, 32], strides = [1, 1]} : vector<16x128xf32> to vector<16x32xf32>
    %20 = math.tanh %19 : vector<16x32xf32>
    %21 = vector.extract_strided_slice %18 {offsets = [0, 0], sizes = [16, 32], strides = [1, 1]} : vector<16x96xf32> to vector<16x32xf32>
    %22 = vector.extract_strided_slice %18 {offsets = [0, 32], sizes = [16, 32], strides = [1, 1]} : vector<16x96xf32> to vector<16x32xf32>
    %23 = vector.extract_strided_slice %18 {offsets = [0, 64], sizes = [16, 32], strides = [1, 1]} : vector<16x96xf32> to vector<16x32xf32>
    %24 = arith.mulf %22, %8 : vector<16x32xf32>
    %25 = arith.mulf %21, %20 : vector<16x32xf32>
    %26 = arith.addf %24, %25 : vector<16x32xf32>
    %27 = math.tanh %26 : vector<16x32xf32>
    %28 = arith.mulf %23, %27 : vector<16x32xf32>
    %29 = vector.extract_strided_slice %5 {offsets = [16, 0], sizes = [16, 128], strides = [1, 1]} : vector<128x128xf32> to vector<16x128xf32>
    %30 = arith.truncf %28 : vector<16x32xf32> to vector<16x32xbf16>
    %cst_11 = arith.constant dense<0.000000e+00> : vector<16x128xf32>
    %31 = tpu.matmul %30, %6, %cst_11 {dimension_numbers = #tpu.dot_dimension_numbers<[1], [0], [0], [1], [0, 0, 1, 1], [], []>} : vector<16x32xbf16>, vector<32x128xbf16>, vector<16x128xf32> -> vector<16x128xf32>
    %32 = arith.addf %29, %31 : vector<16x128xf32>
    %33 = vector.extract_strided_slice %32 {offsets = [0, 0], sizes = [16, 96], strides = [1, 1]} : vector<16x128xf32> to vector<16x96xf32>
    %34 = arith.negf %33 : vector<16x96xf32>
    %35 = math.exp %34 : vector<16x96xf32>
    %cst_12 = arith.constant 1.000000e+00 : f32
    %36 = vector.broadcast %cst_12 : f32 to vector<16x96xf32>
    %37 = arith.addf %36, %35 : vector<16x96xf32>
    %38 = arith.divf %36, %37 : vector<16x96xf32>
    %39 = vector.extract_strided_slice %32 {offsets = [0, 96], sizes = [16, 32], strides = [1, 1]} : vector<16x128xf32> to vector<16x32xf32>
    %40 = math.tanh %39 : vector<16x32xf32>
    %41 = vector.extract_strided_slice %38 {offsets = [0, 0], sizes = [16, 32], strides = [1, 1]} : vector<16x96xf32> to vector<16x32xf32>
    %42 = vector.extract_strided_slice %38 {offsets = [0, 32], sizes = [16, 32], strides = [1, 1]} : vector<16x96xf32> to vector<16x32xf32>
    %43 = vector.extract_strided_slice %38 {offsets = [0, 64], sizes = [16, 32], strides = [1, 1]} : vector<16x96xf32> to vector<16x32xf32>
    %44 = arith.mulf %42, %26 : vector<16x32xf32>
    %45 = arith.mulf %41, %40 : vector<16x32xf32>
    %46 = arith.addf %44, %45 : vector<16x32xf32>
    %47 = math.tanh %46 : vector<16x32xf32>
    %48 = arith.mulf %43, %47 : vector<16x32xf32>
    %49 = vector.extract_strided_slice %5 {offsets = [32, 0], sizes = [16, 128], strides = [1, 1]} : vector<128x128xf32> to vector<16x128xf32>
    %50 = arith.truncf %48 : vector<16x32xf32> to vector<16x32xbf16>
    %cst_13 = arith.constant dense<0.000000e+00> : vector<16x128xf32>
    %51 = tpu.matmul %50, %6, %cst_13 {dimension_numbers = #tpu.dot_dimension_numbers<[1], [0], [0], [1], [0, 0, 1, 1], [], []>} : vector<16x32xbf16>, vector<32x128xbf16>, vector<16x128xf32> -> vector<16x128xf32>
    %52 = arith.addf %49, %51 : vector<16x128xf32>
    %53 = vector.extract_strided_slice %52 {offsets = [0, 0], sizes = [16, 96], strides = [1, 1]} : vector<16x128xf32> to vector<16x96xf32>
    %54 = arith.negf %53 : vector<16x96xf32>
    %55 = math.exp %54 : vector<16x96xf32>
    %cst_14 = arith.constant 1.000000e+00 : f32
    %56 = vector.broadcast %cst_14 : f32 to vector<16x96xf32>
    %57 = arith.addf %56, %55 : vector<16x96xf32>
    %58 = arith.divf %56, %57 : vector<16x96xf32>
    %59 = vector.extract_strided_slice %52 {offsets = [0, 96], sizes = [16, 32], strides = [1, 1]} : vector<16x128xf32> to vector<16x32xf32>
    %60 = math.tanh %59 : vector<16x32xf32>
    %61 = vector.extract_strided_slice %58 {offsets = [0, 0], sizes = [16, 32], strides = [1, 1]} : vector<16x96xf32> to vector<16x32xf32>
    %62 = vector.extract_strided_slice %58 {offsets = [0, 32], sizes = [16, 32], strides = [1, 1]} : vector<16x96xf32> to vector<16x32xf32>
    %63 = vector.extract_strided_slice %58 {offsets = [0, 64], sizes = [16, 32], strides = [1, 1]} : vector<16x96xf32> to vector<16x32xf32>
    %64 = arith.mulf %62, %46 : vector<16x32xf32>
    %65 = arith.mulf %61, %60 : vector<16x32xf32>
    %66 = arith.addf %64, %65 : vector<16x32xf32>
    %67 = math.tanh %66 : vector<16x32xf32>
    %68 = arith.mulf %63, %67 : vector<16x32xf32>
    %69 = vector.extract_strided_slice %5 {offsets = [48, 0], sizes = [16, 128], strides = [1, 1]} : vector<128x128xf32> to vector<16x128xf32>
    %70 = arith.truncf %68 : vector<16x32xf32> to vector<16x32xbf16>
    %cst_15 = arith.constant dense<0.000000e+00> : vector<16x128xf32>
    %71 = tpu.matmul %70, %6, %cst_15 {dimension_numbers = #tpu.dot_dimension_numbers<[1], [0], [0], [1], [0, 0, 1, 1], [], []>} : vector<16x32xbf16>, vector<32x128xbf16>, vector<16x128xf32> -> vector<16x128xf32>
    %72 = arith.addf %69, %71 : vector<16x128xf32>
    %73 = vector.extract_strided_slice %72 {offsets = [0, 0], sizes = [16, 96], strides = [1, 1]} : vector<16x128xf32> to vector<16x96xf32>
    %74 = arith.negf %73 : vector<16x96xf32>
    %75 = math.exp %74 : vector<16x96xf32>
    %cst_16 = arith.constant 1.000000e+00 : f32
    %76 = vector.broadcast %cst_16 : f32 to vector<16x96xf32>
    %77 = arith.addf %76, %75 : vector<16x96xf32>
    %78 = arith.divf %76, %77 : vector<16x96xf32>
    %79 = vector.extract_strided_slice %72 {offsets = [0, 96], sizes = [16, 32], strides = [1, 1]} : vector<16x128xf32> to vector<16x32xf32>
    %80 = math.tanh %79 : vector<16x32xf32>
    %81 = vector.extract_strided_slice %78 {offsets = [0, 0], sizes = [16, 32], strides = [1, 1]} : vector<16x96xf32> to vector<16x32xf32>
    %82 = vector.extract_strided_slice %78 {offsets = [0, 32], sizes = [16, 32], strides = [1, 1]} : vector<16x96xf32> to vector<16x32xf32>
    %83 = vector.extract_strided_slice %78 {offsets = [0, 64], sizes = [16, 32], strides = [1, 1]} : vector<16x96xf32> to vector<16x32xf32>
    %84 = arith.mulf %82, %66 : vector<16x32xf32>
    %85 = arith.mulf %81, %80 : vector<16x32xf32>
    %86 = arith.addf %84, %85 : vector<16x32xf32>
    %87 = math.tanh %86 : vector<16x32xf32>
    %88 = arith.mulf %83, %87 : vector<16x32xf32>
    %89 = vector.extract_strided_slice %5 {offsets = [64, 0], sizes = [16, 128], strides = [1, 1]} : vector<128x128xf32> to vector<16x128xf32>
    %90 = arith.truncf %88 : vector<16x32xf32> to vector<16x32xbf16>
    %cst_17 = arith.constant dense<0.000000e+00> : vector<16x128xf32>
    %91 = tpu.matmul %90, %6, %cst_17 {dimension_numbers = #tpu.dot_dimension_numbers<[1], [0], [0], [1], [0, 0, 1, 1], [], []>} : vector<16x32xbf16>, vector<32x128xbf16>, vector<16x128xf32> -> vector<16x128xf32>
    %92 = arith.addf %89, %91 : vector<16x128xf32>
    %93 = vector.extract_strided_slice %92 {offsets = [0, 0], sizes = [16, 96], strides = [1, 1]} : vector<16x128xf32> to vector<16x96xf32>
    %94 = arith.negf %93 : vector<16x96xf32>
    %95 = math.exp %94 : vector<16x96xf32>
    %cst_18 = arith.constant 1.000000e+00 : f32
    %96 = vector.broadcast %cst_18 : f32 to vector<16x96xf32>
    %97 = arith.addf %96, %95 : vector<16x96xf32>
    %98 = arith.divf %96, %97 : vector<16x96xf32>
    %99 = vector.extract_strided_slice %92 {offsets = [0, 96], sizes = [16, 32], strides = [1, 1]} : vector<16x128xf32> to vector<16x32xf32>
    %100 = math.tanh %99 : vector<16x32xf32>
    %101 = vector.extract_strided_slice %98 {offsets = [0, 0], sizes = [16, 32], strides = [1, 1]} : vector<16x96xf32> to vector<16x32xf32>
    %102 = vector.extract_strided_slice %98 {offsets = [0, 32], sizes = [16, 32], strides = [1, 1]} : vector<16x96xf32> to vector<16x32xf32>
    %103 = vector.extract_strided_slice %98 {offsets = [0, 64], sizes = [16, 32], strides = [1, 1]} : vector<16x96xf32> to vector<16x32xf32>
    %104 = arith.mulf %102, %86 : vector<16x32xf32>
    %105 = arith.mulf %101, %100 : vector<16x32xf32>
    %106 = arith.addf %104, %105 : vector<16x32xf32>
    %107 = math.tanh %106 : vector<16x32xf32>
    %108 = arith.mulf %103, %107 : vector<16x32xf32>
    %109 = vector.extract_strided_slice %5 {offsets = [80, 0], sizes = [16, 128], strides = [1, 1]} : vector<128x128xf32> to vector<16x128xf32>
    %110 = arith.truncf %108 : vector<16x32xf32> to vector<16x32xbf16>
    %cst_19 = arith.constant dense<0.000000e+00> : vector<16x128xf32>
    %111 = tpu.matmul %110, %6, %cst_19 {dimension_numbers = #tpu.dot_dimension_numbers<[1], [0], [0], [1], [0, 0, 1, 1], [], []>} : vector<16x32xbf16>, vector<32x128xbf16>, vector<16x128xf32> -> vector<16x128xf32>
    %112 = arith.addf %109, %111 : vector<16x128xf32>
    %113 = vector.extract_strided_slice %112 {offsets = [0, 0], sizes = [16, 96], strides = [1, 1]} : vector<16x128xf32> to vector<16x96xf32>
    %114 = arith.negf %113 : vector<16x96xf32>
    %115 = math.exp %114 : vector<16x96xf32>
    %cst_20 = arith.constant 1.000000e+00 : f32
    %116 = vector.broadcast %cst_20 : f32 to vector<16x96xf32>
    %117 = arith.addf %116, %115 : vector<16x96xf32>
    %118 = arith.divf %116, %117 : vector<16x96xf32>
    %119 = vector.extract_strided_slice %112 {offsets = [0, 96], sizes = [16, 32], strides = [1, 1]} : vector<16x128xf32> to vector<16x32xf32>
    %120 = math.tanh %119 : vector<16x32xf32>
    %121 = vector.extract_strided_slice %118 {offsets = [0, 0], sizes = [16, 32], strides = [1, 1]} : vector<16x96xf32> to vector<16x32xf32>
    %122 = vector.extract_strided_slice %118 {offsets = [0, 32], sizes = [16, 32], strides = [1, 1]} : vector<16x96xf32> to vector<16x32xf32>
    %123 = vector.extract_strided_slice %118 {offsets = [0, 64], sizes = [16, 32], strides = [1, 1]} : vector<16x96xf32> to vector<16x32xf32>
    %124 = arith.mulf %122, %106 : vector<16x32xf32>
    %125 = arith.mulf %121, %120 : vector<16x32xf32>
    %126 = arith.addf %124, %125 : vector<16x32xf32>
    %127 = math.tanh %126 : vector<16x32xf32>
    %128 = arith.mulf %123, %127 : vector<16x32xf32>
    %129 = vector.extract_strided_slice %5 {offsets = [96, 0], sizes = [16, 128], strides = [1, 1]} : vector<128x128xf32> to vector<16x128xf32>
    %130 = arith.truncf %128 : vector<16x32xf32> to vector<16x32xbf16>
    %cst_21 = arith.constant dense<0.000000e+00> : vector<16x128xf32>
    %131 = tpu.matmul %130, %6, %cst_21 {dimension_numbers = #tpu.dot_dimension_numbers<[1], [0], [0], [1], [0, 0, 1, 1], [], []>} : vector<16x32xbf16>, vector<32x128xbf16>, vector<16x128xf32> -> vector<16x128xf32>
    %132 = arith.addf %129, %131 : vector<16x128xf32>
    %133 = vector.extract_strided_slice %132 {offsets = [0, 0], sizes = [16, 96], strides = [1, 1]} : vector<16x128xf32> to vector<16x96xf32>
    %134 = arith.negf %133 : vector<16x96xf32>
    %135 = math.exp %134 : vector<16x96xf32>
    %cst_22 = arith.constant 1.000000e+00 : f32
    %136 = vector.broadcast %cst_22 : f32 to vector<16x96xf32>
    %137 = arith.addf %136, %135 : vector<16x96xf32>
    %138 = arith.divf %136, %137 : vector<16x96xf32>
    %139 = vector.extract_strided_slice %132 {offsets = [0, 96], sizes = [16, 32], strides = [1, 1]} : vector<16x128xf32> to vector<16x32xf32>
    %140 = math.tanh %139 : vector<16x32xf32>
    %141 = vector.extract_strided_slice %138 {offsets = [0, 0], sizes = [16, 32], strides = [1, 1]} : vector<16x96xf32> to vector<16x32xf32>
    %142 = vector.extract_strided_slice %138 {offsets = [0, 32], sizes = [16, 32], strides = [1, 1]} : vector<16x96xf32> to vector<16x32xf32>
    %143 = vector.extract_strided_slice %138 {offsets = [0, 64], sizes = [16, 32], strides = [1, 1]} : vector<16x96xf32> to vector<16x32xf32>
    %144 = arith.mulf %142, %126 : vector<16x32xf32>
    %145 = arith.mulf %141, %140 : vector<16x32xf32>
    %146 = arith.addf %144, %145 : vector<16x32xf32>
    %147 = math.tanh %146 : vector<16x32xf32>
    %148 = arith.mulf %143, %147 : vector<16x32xf32>
    %149 = vector.extract_strided_slice %5 {offsets = [112, 0], sizes = [16, 128], strides = [1, 1]} : vector<128x128xf32> to vector<16x128xf32>
    %150 = arith.truncf %148 : vector<16x32xf32> to vector<16x32xbf16>
    %cst_23 = arith.constant dense<0.000000e+00> : vector<16x128xf32>
    %151 = tpu.matmul %150, %6, %cst_23 {dimension_numbers = #tpu.dot_dimension_numbers<[1], [0], [0], [1], [0, 0, 1, 1], [], []>} : vector<16x32xbf16>, vector<32x128xbf16>, vector<16x128xf32> -> vector<16x128xf32>
    %152 = arith.addf %149, %151 : vector<16x128xf32>
    %153 = vector.extract_strided_slice %152 {offsets = [0, 0], sizes = [16, 96], strides = [1, 1]} : vector<16x128xf32> to vector<16x96xf32>
    %154 = arith.negf %153 : vector<16x96xf32>
    %155 = math.exp %154 : vector<16x96xf32>
    %cst_24 = arith.constant 1.000000e+00 : f32
    %156 = vector.broadcast %cst_24 : f32 to vector<16x96xf32>
    %157 = arith.addf %156, %155 : vector<16x96xf32>
    %158 = arith.divf %156, %157 : vector<16x96xf32>
    %159 = vector.extract_strided_slice %152 {offsets = [0, 96], sizes = [16, 32], strides = [1, 1]} : vector<16x128xf32> to vector<16x32xf32>
    %160 = math.tanh %159 : vector<16x32xf32>
    %161 = vector.extract_strided_slice %158 {offsets = [0, 0], sizes = [16, 32], strides = [1, 1]} : vector<16x96xf32> to vector<16x32xf32>
    %162 = vector.extract_strided_slice %158 {offsets = [0, 32], sizes = [16, 32], strides = [1, 1]} : vector<16x96xf32> to vector<16x32xf32>
    %163 = vector.extract_strided_slice %158 {offsets = [0, 64], sizes = [16, 32], strides = [1, 1]} : vector<16x96xf32> to vector<16x32xf32>
    %164 = arith.mulf %162, %146 : vector<16x32xf32>
    %165 = arith.mulf %161, %160 : vector<16x32xf32>
    %166 = arith.addf %164, %165 : vector<16x32xf32>
    %167 = math.tanh %166 : vector<16x32xf32>
    %168 = arith.mulf %163, %167 : vector<16x32xf32>
    %169 = arith.truncf %168 : vector<16x32xf32> to vector<16x32xbf16>
    %c0_25 = arith.constant 0 : index
    %c0_26 = arith.constant 0 : index
    %170 = vector.load %arg4[%c0_25, %c0_26] : memref<32x32xbf16, #tpu.memory_space<vmem>>, vector<32x32xbf16>
    %cst_27 = arith.constant dense<0.000000e+00> : vector<16x32xf32>
    %171 = tpu.matmul %169, %170, %cst_27 {dimension_numbers = #tpu.dot_dimension_numbers<[1], [0], [0], [1], [0, 0, 1, 1], [], []>} : vector<16x32xbf16>, vector<32x32xbf16>, vector<16x32xf32> -> vector<16x32xf32>
    %c0_28 = arith.constant 0 : index
    %c0_29 = arith.constant 0 : index
    %172 = vector.load %arg5[%c0_28, %c0_29] : memref<1x32xf32, #tpu.memory_space<vmem>>, vector<1x32xf32>
    %173 = vector.broadcast %172 : vector<1x32xf32> to vector<16x32xf32>
    %174 = arith.addf %171, %173 : vector<16x32xf32>
    %c0_30 = arith.constant 0 : index
    %c0_31 = arith.constant 0 : index
    %175 = vector.load %arg6[%c0_30, %c0_31] : memref<16x48xbf16, #tpu.memory_space<vmem>>, vector<16x48xbf16>
    %176 = arith.truncf %174 : vector<16x32xf32> to vector<16x32xbf16>
    %c0_32 = arith.constant 0 : index
    %c0_33 = arith.constant 0 : index
    %177 = vector.load %arg7[%c0_32, %c0_33] : memref<32x128xbf16, #tpu.memory_space<vmem>>, vector<32x128xbf16>
    %cst_34 = arith.constant dense<0.000000e+00> : vector<16x128xf32>
    %178 = tpu.matmul %176, %177, %cst_34 {dimension_numbers = #tpu.dot_dimension_numbers<[1], [0], [0], [1], [0, 0, 1, 1], [], []>} : vector<16x32xbf16>, vector<32x128xbf16>, vector<16x128xf32> -> vector<16x128xf32>
    %179 = vector.extract_strided_slice %178 {offsets = [0, 32], sizes = [16, 32], strides = [1, 1]} : vector<16x128xf32> to vector<16x32xf32>
    %180 = vector.extract_strided_slice %178 {offsets = [0, 64], sizes = [16, 32], strides = [1, 1]} : vector<16x128xf32> to vector<16x32xf32>
    %181 = vector.extract_strided_slice %178 {offsets = [0, 96], sizes = [16, 32], strides = [1, 1]} : vector<16x128xf32> to vector<16x32xf32>
    %182 = tpu.concatenate %179, %180, %181 in 0 : vector<16x32xf32>, vector<16x32xf32>, vector<16x32xf32> -> vector<48x32xf32>
    %183 = arith.truncf %182 : vector<48x32xf32> to vector<48x32xbf16>
    %184 = vector.extract_strided_slice %178 {offsets = [0, 0], sizes = [16, 32], strides = [1, 1]} : vector<16x128xf32> to vector<16x32xf32>
    %c0_35 = arith.constant 0 : index
    %c0_36 = arith.constant 0 : index
    %185 = vector.load %arg8[%c0_35, %c0_36] : memref<1x32xf32, #tpu.memory_space<vmem>>, vector<1x32xf32>
    %186 = vector.broadcast %185 : vector<1x32xf32> to vector<16x32xf32>
    %187 = arith.addf %184, %186 : vector<16x32xf32>
    %cst_37 = arith.constant dense<0.000000e+00> : vector<16x32xf32>
    %188 = tpu.matmul %175, %183, %cst_37 {dimension_numbers = #tpu.dot_dimension_numbers<[1], [0], [0], [1], [0, 0, 1, 1], [], []>} : vector<16x48xbf16>, vector<48x32xbf16>, vector<16x32xf32> -> vector<16x32xf32>
    %189 = arith.addf %187, %188 : vector<16x32xf32>
    %cst_38 = arith.constant 0.000000e+00 : f32
    %190 = vector.broadcast %cst_38 : f32 to vector<16x32xf32>
    %191 = arith.maximumf %189, %190 : vector<16x32xf32>
    %192 = arith.truncf %191 : vector<16x32xf32> to vector<16x32xbf16>
    %c0_39 = arith.constant 0 : index
    %c0_40 = arith.constant 0 : index
    %193 = vector.load %arg9[%c0_39, %c0_40] : memref<32x64xbf16, #tpu.memory_space<vmem>>, vector<32x64xbf16>
    %cst_41 = arith.constant dense<0.000000e+00> : vector<16x64xf32>
    %194 = tpu.matmul %192, %193, %cst_41 {dimension_numbers = #tpu.dot_dimension_numbers<[1], [0], [0], [1], [0, 0, 1, 1], [], []>} : vector<16x32xbf16>, vector<32x64xbf16>, vector<16x64xf32> -> vector<16x64xf32>
    %195 = vector.extract_strided_slice %194 {offsets = [0, 16], sizes = [16, 16], strides = [1, 1]} : vector<16x64xf32> to vector<16x16xf32>
    %196 = vector.extract_strided_slice %194 {offsets = [0, 32], sizes = [16, 16], strides = [1, 1]} : vector<16x64xf32> to vector<16x16xf32>
    %197 = vector.extract_strided_slice %194 {offsets = [0, 48], sizes = [16, 16], strides = [1, 1]} : vector<16x64xf32> to vector<16x16xf32>
    %198 = tpu.concatenate %195, %196, %197 in 0 : vector<16x16xf32>, vector<16x16xf32>, vector<16x16xf32> -> vector<48x16xf32>
    %199 = arith.truncf %198 : vector<48x16xf32> to vector<48x16xbf16>
    %200 = vector.extract_strided_slice %194 {offsets = [0, 0], sizes = [16, 16], strides = [1, 1]} : vector<16x64xf32> to vector<16x16xf32>
    %c0_42 = arith.constant 0 : index
    %c0_43 = arith.constant 0 : index
    %201 = vector.load %arg10[%c0_42, %c0_43] : memref<1x16xf32, #tpu.memory_space<vmem>>, vector<1x16xf32>
    %202 = vector.broadcast %201 : vector<1x16xf32> to vector<16x16xf32>
    %203 = arith.addf %200, %202 : vector<16x16xf32>
    %cst_44 = arith.constant dense<0.000000e+00> : vector<16x16xf32>
    %204 = tpu.matmul %175, %199, %cst_44 {dimension_numbers = #tpu.dot_dimension_numbers<[1], [0], [0], [1], [0, 0, 1, 1], [], []>} : vector<16x48xbf16>, vector<48x16xbf16>, vector<16x16xf32> -> vector<16x16xf32>
    %205 = arith.addf %203, %204 : vector<16x16xf32>
    %c0_45 = arith.constant 0 : index
    %c0_46 = arith.constant 0 : index
    %206 = vector.load %arg11[%c0_45, %c0_46] : memref<16x16xf32, #tpu.memory_space<vmem>>, vector<16x16xf32>
    tpu.vector_store %arg11[%c0_45, %c0_46], %205 {strides = array<i32>} : memref<16x16xf32, #tpu.memory_space<vmem>>, vector<16x16xf32>,
    return
  }
}

</mosaic_0001>

<bundles_post_ra>
// kernel: tpu_custom_call.1
= control target key start
LH: loop header
LB: loop body
LE: loop exit
PB: predicated region body
PF: predicated region fallthrough
CT: control target
= control target key end

     0   :  { %16 = vsyncpa [#allocation3], 0  ;;  %s2262_s0 = inlined_call_operand.vmem [shape: bf16[128,8], index: 0, kind: input, shape index: {}]   ;;  %s2263_s1 = inlined_call_operand.hbm [shape: bf16[8,128], index: 1, kind: input, shape index: {}]   ;;  %s2264_s2 = inlined_call_operand.vmem [shape: bf16[32,128], index: 2, kind: input, shape index: {}]   ;;  %s2265_s3 = inlined_call_operand.vmem [shape: f32[1,128], index: 3, kind: input, shape index: {}]   ;;  %s2266_s4 = inlined_call_operand.vmem [shape: bf16[32,32], index: 4, kind: input, shape index: {}]   ;;  %s2267_s5 = inlined_call_operand.vmem [shape: f32[1,32], index: 5, kind: input, shape index: {}]   ;;  %s2268_s6 = inlined_call_operand.vmem [shape: bf16[16,48], index: 6, kind: input, shape index: {}]   ;;  %s2269_s7 = inlined_call_operand.vmem [shape: bf16[32,128], index: 7, kind: input, shape index: {}]   ;;  %s2270_s8 = inlined_call_operand.vmem [shape: f32[1,32], index: 8, kind: input, shape index: {}]   ;;  %s2271_s9 = inlined_call_operand.vmem [shape: bf16[32,64], index: 9, kind: input, shape index: {}]   ;;  %s2272_s10 = inlined_call_operand.vmem [shape: f32[1,16], index: 10, kind: input, shape index: {}]   ;;  %s2273_s11 = inlined_call_operand.hbm [shape: f32[16,16], index: 11, kind: output, shape index: {}]  }
   0x1   :  { %17 = vsyncpa [#allocation4], 0  ;;  %s1888_s17 = smov [#allocation2]   ;;  %s1840_s21 = scalar_lea.hbm %s2263_s1, 64 }
   0x2   :  { %s26_s18 = sshll.u32 %s1888_s17, 4  ;;  %p1841_p0 = scmp.ne.s32.totalorder %s2263_s1, %s1840_s21  ;;  %s27_s18 = int_to_ptr.vmem [resolvable:$true] %s26_s18 }
   0x3   :  { %p1844_p1 = scmp.lt.u32.totalorder %s1840_s21, %s2263_s1 }
   0x5   :  { %p1846_p2 = pnand %p1844_p1, %p1841_p0 }
   0x7   :  { %1849 = shalt.err (!%p1846_p2)
}
   0x8   :  { %s1850_s26 = scalar_lea.vmem %s27_s18, 64  ;;  %p1855_p4 = scmp.lt.s32.totalorder %s27_s18, %s27_s18 }
   0x9   :  { %p1851_p3 = scmp.ne.s32.totalorder %s27_s18, %s1850_s26  ;;  %p1856_p5 = scmp.lt.s32.totalorder %s1850_s26, %s1850_s26 }
   0xb   :  { %p1857_p6 = por %p1856_p5, %p1855_p4 }
   0xd   :  { %p1858_p7 = pnand %p1857_p6, %p1851_p3 }
   0xf   :  { %1861 = shalt.err (!%p1858_p7)
}
  0x10   :  { %29 = dma.hbm_to_vmem [thread:$0]  %s2263_s1, 64, %s27_s18, [#allocation3]  }
  0x11   :  { %1884 = dma.done.wait [#allocation3], 64  }
  0x12   :  { %1885 = vsyncadd [#allocation3], 4294967232  ;;  %vm141_vm0 = vcmask 1043456   ;;  %vm116_vm1 = vcmask 64512   ;;  %v68_v0 = vld [vmem:[#allocation2] sm:$0xf] }
  0x13   :  { %1663 = vmatprep.subr.msk.bf16.mxu1 %vm141_vm0, %v68_v0  ;;  %v143_v1 = vsel %vm141_vm0, %v68_v0, 0  ;;  %1662 = vmatprep.subr.msk.bf16.mxu0 %vm141_vm0, %v68_v0  ;;  %v1695_v2 = vld [vmem:[%s2262_s0 + $0x30] sm:$0xff]   ;;  %v1696_v3 = vld [vmem:[%s2262_s0 + $0x38] sm:$0xff]   ;;  %v1889_v4 = vmov 0.0   ;;  %v1982_v5 = vld [vmem:[%s2264_s2] sm:$0xff]   ;;  %vm1890_vm2 = vmmov 0  }
  0x14   :  { %1661 = vmatpush3.bf16.msra.mxu1 %v143_v1  ;;  %1535 = vmatpush3.bf16.msra.mxu0 %v143_v1  ;;  %v1698_v6 = vld [vmem:[%s2262_s0] sm:$0xff]   ;;  %v1699_v7 = vld [vmem:[%s2262_s0 + $0x8] sm:$0xff]   ;;  %v1891_v9 = vmov 0   ;;  %s1892_s22 = smov 32   ;;  %vm258_vm3 = vcmask 261120   ;;  %vm1216_vm4 = vcmask 392192  }
  0x15   :  { %1548 = vmatprep.mubr.msk.bf16.mxu1 %vm116_vm1, %v1695_v2  ;;  %1552 = vmatprep.subr.bf16.mxu1 %v1889_v4  ;;  %v1997_v8 = vld [vmem:[%s2264_s2 + $0x8] sm:$0xff]   ;;  %v2028_v16 = vld [vmem:[%s2265_s3] ss:$0 sm:$0xff]  ;;  %s1893_s3 = smov 64   ;;  %vm1407_vm5 = vcmask 130048   ;;  %s1896_s24 = smov [#allocation5]  }
  0x16   :  { %1584 = vmatprep.subr.bf16.mxu0 %v1889_v4  ;;  %1536 = vmatprep.mubr.msk.bf16.mxu0 %vm116_vm1, %v1698_v6  ;;  %s1415_s25 = sshll.u32 %s1896_s24, 4  ;;  %s1416_s25 = int_to_ptr.vmem [resolvable:$true] %s1415_s25 }
  0x17   :  { %1549 = vmatmul.mubr.msk.bf16.vlgmr.msra.gmra.mrb[0].mxu1 %vm116_vm1, %v1696_v3  ;;  %1537 = vmatmul.mubr.msk.bf16.vlgmr.msra.gmra.mrb[0].mxu0 %vm116_vm1, %v1699_v7  ;;  %s1862_s26 = scalar_lea.vmem %s1416_s25, 256  ;;  %p1867_p9 = scmp.lt.s32.totalorder %s1416_s25, %s1416_s25 }
  0x18   :  { %1553 = vmatpush3.bf16.msra.mxu1 %v1982_v5  ;;  %1556 = vmatprep.mubr.msk.bf16.mxu1 %vm1890_vm2, %v1889_v4  ;;  %p1863_p8 = scmp.ne.s32.totalorder %s1416_s25, %s1862_s26  ;;  %p1868_p10 = scmp.lt.s32.totalorder %s1862_s26, %s1862_s26 }
  0x19   :  { %1554 = vmatprep.subr.bf16.mxu1 %v1889_v4  ;;  %1585 = vmatpush3.bf16.msra.mxu0 %v1982_v5 }
  0x1a   :  { %1586 = vmatprep.subr.bf16.mxu0 %v1889_v4  ;;  %p1869_p11 = por %p1868_p10, %p1867_p9 }
  0x1c   :  { %1555 = vmatpush3.bf16.msra.mxu1 %v1997_v8  ;;  %p1870_p12 = pnand %p1869_p11, %p1863_p8 }
  0x1d   :  { %1560 = vmatprep.subr.bf16.mxu1 %v1889_v4  ;;  %1587 = vmatpush3.bf16.msra.mxu0 %v1997_v8 }
  0x1e   :  { %1600 = vmatprep.subr.bf16.mxu0 %v1889_v4 }
  0x1f   :  { %1557 = vmatmul.mubr.bf16.vlgmr.msra.gmra.mrb[4].mxu1 %v1891_v9 }
  0x20   :  { %1561 = vmatpush3.bf16.msra.mxu1 %v1982_v5  ;;  %1564 = vmatprep.mubr.msk.bf16.mxu1 %vm1890_vm2, %v1889_v4 }
  0x21   :  { %1562 = vmatprep.subr.bf16.mxu1 %v1889_v4 }
  0x24   :  { %1563 = vmatpush3.bf16.msra.mxu1 %v1997_v8 }
  0x25   :  { %1568 = vmatprep.subr.bf16.mxu1 %v1889_v4 }
  0xea   :  { %v2015_v10 = vpop.f32.mrb[0].mxu1  ;;  %v2021_v13 = vpop.f32.mrb[0].mxu0 }
  0xeb   :  { %v2017_v11 = vpop.f32.mrb[1].mxu1  ;;  %v179_v15 = vpop.f32.mrb[1].mxu0  ;;  %v188_v55 = vadd.f32 %v2021_v13, %v2028_v16 }
  0xec   :  { %v2019_v12 = vpop.f32.mrb[2].mxu1  ;;  %v2030_v17 = vpop.f32.mrb[2].mxu0  ;;  %v180_v18 = vadd.f32 %v2028_v16, %v179_v15 }
  0xed   :  { %v2023_v14 = vpop.f32.mrb[3].mxu1  ;;  %v182_v19 = vpop.f32.mrb[3].mxu0  ;;  %v191_v57 = vadd.f32 %v2030_v17, %v2028_v16 }
  0xee   :  { %v183_v21 = vadd.f32 %v2028_v16, %v182_v19 }
  0xf2   :  { %v296_v20 = vpop.f32.mrb[4].mxu1 }
  0xf3   :  { %v303_v22 = vadd.f32 %v296_v20, %v180_v18  ;;  %v1558_v23 = vpop.f32.mrb[5].mxu1 }
  0xf4   :  { %v299_v24 = vpop.f32.mrb[6].mxu1 }
  0xf5   :  { %1712 = vtanh.f32 %v303_v22  ;;  %v304_v25 = vadd.f32 %v299_v24, %v183_v21  ;;  %v1559_v26 = vpop.f32.mrb[7].mxu1  ;;  %v1446_v29 = vmul.f32 -1.442695, %v303_v22 }
  0xf7   :  { %1714 = vtanh.f32 %v304_v25  ;;  %v1447_v30 = vmul.f32 -1.442695, %v304_v25 }
  0xf8   :  { %1716 = vpow2.f32 %v1446_v29 }
  0xf9   :  { %1718 = vpow2.f32 %v1447_v30 }
  0xff   :  { %v1713_v27 = vpop.eup %1712 }
 0x100   :  { %323 = vrot.lane.b32.xlu0 %v1713_v27, %s1892_s22  ;;  %v1701_v27 = vld [vmem:[%s2262_s0 + $0x10] sm:$0xff]  }
 0x101   :  { %v1715_v28 = vpop.eup %1714  ;;  %1540 = vmatprep.mubr.msk.bf16.mxu0 %vm116_vm1, %v1701_v27 }
 0x102   :  { %v1717_v31 = vpop.eup %1716 }
 0x103   :  { %v311_v32 = vadd.f32 1.0, %v1717_v31  ;;  %v1719_v33 = vpop.eup %1718 }
 0x104   :  { %325 = vrot.lane.b32.xlu0 %v1715_v28, %s1892_s22  ;;  %v312_v34 = vadd.f32 1.0, %v1719_v33  ;;  %v1702_v28 = vld [vmem:[%s2262_s0 + $0x18] sm:$0xff]  }
 0x105   :  { %1720 = vrcp.f32 %v311_v32  ;;  %1541 = vmatmul.mubr.msk.bf16.gmra.mrb[4].mxu0 %vm116_vm1, %v1702_v28 }
 0x106   :  { %1722 = vrcp.f32 %v312_v34 }
 0x10f   :  { %v1721_v35 = vpop.eup %1720 }
 0x110   :  { %v1723_v38 = vpop.eup %1722  ;;  %v319_v41 = vmul.f32 0.0, %v1721_v35 }
 0x111   :  { %v320_v44 = vmul.f32 0.0, %v1723_v38 }
 0x172   :  { %v324_v36 = vpop.permute.xlu0 %323 }
 0x173   :  { %v329_v37 = vmul.f32 %v1721_v35, %v324_v36 }
 0x175   :  { %333 = vrot.lane.b32.xlu1 %v329_v37, %s1892_s22 }
 0x176   :  { %v326_v39 = vpop.permute.xlu0 %325 }
 0x177   :  { %v330_v40 = vmul.f32 %v1723_v38, %v326_v39 }
 0x179   :  { %335 = vrot.lane.b32.xlu1 %v330_v40, %s1892_s22 }
 0x1d8   :  { %v2070_v36 = vpop.f32.mrb[4].mxu0 }
 0x1d9   :  { %v195_v37 = vpop.f32.mrb[5].mxu0 }
 0x1e7   :  { %v334_v42 = vpop.permute.xlu1 %333 }
 0x1e8   :  { %v339_v43 = vadd.f32 %v334_v42, %v319_v41  ;;  %v196_v41 = vadd.f32 %v2028_v16, %v195_v37 }
 0x1ea   :  { %1724 = vtanh.f32 %v339_v43 }
 0x1eb   :  { %v336_v45 = vpop.permute.xlu1 %335 }
 0x1ec   :  { %v340_v46 = vadd.f32 %v336_v45, %v320_v44 }
 0x1ee   :  { %1726 = vtanh.f32 %v340_v46 }
 0x1f4   :  { %v1725_v47 = vpop.eup %1724 }
 0x1f5   :  { %345 = vrot.lane.b32.xlu0 %v1725_v47, %s1892_s22 }
 0x1f8   :  { %v1727_v48 = vpop.eup %1726 }
 0x1f9   :  { %347 = vrot.lane.b32.xlu1 %v1727_v48, %s1892_s22 }
 0x267   :  { %v346_v49 = vpop.permute.xlu0 %345 }
 0x268   :  { %v351_v51 = vmul.f32 %v1721_v35, %v346_v49 }
 0x26b   :  { %v348_v50 = vpop.permute.xlu1 %347 }
 0x26c   :  { %v352_v52 = vmul.f32 %v1723_v38, %v348_v50  ;;  %v2072_v38 = vpop.f32.mrb[6].mxu0 }
 0x26d   :  { %v198_v39 = vpop.f32.mrb[7].mxu0 }
 0x26e   :  { %v353_v53 = vpack.c.bf16 %v352_v52, %v351_v51 }
 0x270   :  { %355 = vrot.lane.b32.xlu0 %v353_v53, %s1893_s3 }
 0x2e2   :  { %v356_v54 = vpop.permute.xlu0 %355 }
 0x2e3   :  { %1565 = vmatmul.mubr.msk.bf16.vlgmr.msra.gmra.mrb[8].mxu1 %vm258_vm3, %v356_v54 }
 0x2e4   :  { %1569 = vmatpush3.bf16.msra.mxu1 %v1982_v5  ;;  %1572 = vmatprep.mubr.msk.bf16.mxu1 %vm1890_vm2, %v1889_v4 }
 0x2e5   :  { %1570 = vmatprep.subr.bf16.mxu1 %v1889_v4 }
 0x2e8   :  { %1571 = vmatpush3.bf16.msra.mxu1 %v1997_v8 }
 0x2e9   :  { %1576 = vmatprep.subr.bf16.mxu1 %v1889_v4 }
 0x3b6   :  { %v394_v56 = vpop.f32.mrb[8].mxu1 }
 0x3b7   :  { %v401_v58 = vadd.f32 %v394_v56, %v188_v55  ;;  %v1566_v59 = vpop.f32.mrb[9].mxu1 }
 0x3b8   :  { %v397_v60 = vpop.f32.mrb[10].mxu1 }
 0x3b9   :  { %1728 = vtanh.f32 %v401_v58  ;;  %v402_v61 = vadd.f32 %v397_v60, %v191_v57  ;;  %v1567_v62 = vpop.f32.mrb[11].mxu1  ;;  %v1449_v1 = vmul.f32 -1.442695, %v401_v58 }
 0x3bb   :  { %1730 = vtanh.f32 %v402_v61  ;;  %v1450_v2 = vmul.f32 -1.442695, %v402_v61 }
 0x3bc   :  { %1732 = vpow2.f32 %v1449_v1 }
 0x3bd   :  { %1734 = vpow2.f32 %v1450_v2 }
 0x3c3   :  { %v1729_v63 = vpop.eup %1728 }
 0x3c4   :  { %421 = vrot.lane.b32.xlu1 %v1729_v63, %s1892_s22 }
 0x3c5   :  { %v1731_v0 = vpop.eup %1730 }
 0x3c6   :  { %423 = vrot.lane.b32.xlu0 %v1731_v0, %s1892_s22  ;;  %v1733_v3 = vpop.eup %1732 }
 0x3c7   :  { %v1735_v6 = vpop.eup %1734  ;;  %v409_v7 = vadd.f32 1.0, %v1733_v3 }
 0x3c8   :  { %v410_v9 = vadd.f32 1.0, %v1735_v6 }
 0x3c9   :  { %1736 = vrcp.f32 %v409_v7 }
 0x3ca   :  { %1738 = vrcp.f32 %v410_v9 }
 0x3d3   :  { %v1737_v13 = vpop.eup %1736 }
 0x3d4   :  { %v1739_v18 = vpop.eup %1738  ;;  %v417_v21 = vmul.f32 %v1737_v13, %v339_v43  ;;  %v199_v43 = vadd.f32 %v2028_v16, %v198_v39 }
 0x3d5   :  { %v418_v24 = vmul.f32 %v1739_v18, %v340_v46 }
 0x436   :  { %v422_v15 = vpop.permute.xlu1 %421 }
 0x437   :  { %v427_v17 = vmul.f32 %v1737_v13, %v422_v15 }
 0x438   :  { %v424_v19 = vpop.permute.xlu0 %423 }
 0x439   :  { %431 = vrot.lane.b32.xlu1 %v427_v17, %s1892_s22  ;;  %v428_v20 = vmul.f32 %v1739_v18, %v424_v19 }
 0x43b   :  { %433 = vrot.lane.b32.xlu0 %v428_v20, %s1892_s22 }
 0x4ab   :  { %v432_v22 = vpop.permute.xlu1 %431 }
 0x4ac   :  { %v2056_v23 = vadd.f32 %v432_v22, %v417_v21  ;;  %v204_v21 = vadd.f32 %v2070_v36, %v2028_v16 }
 0x4ad   :  { %v434_v25 = vpop.permute.xlu0 %433 }
 0x4ae   :  { %1740 = vtanh.f32 %v2056_v23  ;;  %v438_v26 = vadd.f32 %v434_v25, %v418_v24 }
 0x4b0   :  { %1742 = vtanh.f32 %v438_v26 }
 0x4b8   :  { %v1741_v29 = vpop.eup %1740 }
 0x4b9   :  { %443 = vrot.lane.b32.xlu1 %v1741_v29, %s1892_s22 }
 0x4ba   :  { %v1743_v30 = vpop.eup %1742 }
 0x4bb   :  { %445 = vrot.lane.b32.xlu0 %v1743_v30, %s1892_s22 }
 0x52b   :  { %v444_v31 = vpop.permute.xlu1 %443 }
 0x52c   :  { %v449_v33 = vmul.f32 %v1737_v13, %v444_v31 }
 0x52d   :  { %v446_v32 = vpop.permute.xlu0 %445 }
 0x52e   :  { %v450_v34 = vmul.f32 %v1739_v18, %v446_v32 }
 0x530   :  { %v451_v35 = vpack.c.bf16 %v450_v34, %v449_v33 }
 0x532   :  { %453 = vrot.lane.b32.xlu1 %v451_v35, %s1893_s3 }
 0x5a4   :  { %v454_v40 = vpop.permute.xlu1 %453 }
 0x5a5   :  { %1573 = vmatmul.mubr.msk.bf16.vlgmr.msra.gmra.mrb[12].mxu1 %vm258_vm3, %v454_v40 }
 0x5a6   :  { %1577 = vmatpush3.bf16.msra.mxu1 %v1982_v5  ;;  %1580 = vmatprep.mubr.msk.bf16.mxu1 %vm1890_vm2, %v1889_v4 }
 0x5a7   :  { %1578 = vmatprep.subr.bf16.mxu1 %v1889_v4 }
 0x5aa   :  { %1579 = vmatpush3.bf16.msra.mxu1 %v1997_v8 }
 0x5ab   :  { %1592 = vmatprep.subr.bf16.mxu1 %v1889_v4 }
 0x678   :  { %v492_v42 = vpop.f32.mrb[12].mxu1 }
 0x679   :  { %v499_v44 = vadd.f32 %v492_v42, %v196_v41  ;;  %v1574_v45 = vpop.f32.mrb[13].mxu1 }
 0x67a   :  { %v495_v46 = vpop.f32.mrb[14].mxu1 }
 0x67b   :  { %1744 = vtanh.f32 %v499_v44  ;;  %v500_v47 = vadd.f32 %v495_v46, %v199_v43  ;;  %v1575_v48 = vpop.f32.mrb[15].mxu1  ;;  %v1452_v51 = vmul.f32 -1.442695, %v499_v44 }
 0x67d   :  { %1746 = vtanh.f32 %v500_v47  ;;  %v1453_v52 = vmul.f32 -1.442695, %v500_v47 }
 0x67e   :  { %1748 = vpow2.f32 %v1452_v51 }
 0x67f   :  { %1750 = vpow2.f32 %v1453_v52 }
 0x685   :  { %v1745_v49 = vpop.eup %1744 }
 0x686   :  { %519 = vrot.lane.b32.xlu0 %v1745_v49, %s1892_s22  ;;  %v1703_v49 = vld [vmem:[%s2262_s0 + $0x20] sm:$0xff]  }
 0x687   :  { %v1747_v50 = vpop.eup %1746  ;;  %1544 = vmatprep.mubr.msk.bf16.mxu0 %vm116_vm1, %v1703_v49 }
 0x688   :  { %521 = vrot.lane.b32.xlu1 %v1747_v50, %s1892_s22  ;;  %v1749_v53 = vpop.eup %1748  ;;  %v1704_v50 = vld [vmem:[%s2262_s0 + $0x28] sm:$0xff]  }
 0x689   :  { %v1751_v54 = vpop.eup %1750  ;;  %v507_v55 = vadd.f32 1.0, %v1749_v53  ;;  %1545 = vmatmul.mubr.msk.bf16.gmra.mrb[8].mxu0 %vm116_vm1, %v1704_v50 }
 0x68a   :  { %v508_v56 = vadd.f32 1.0, %v1751_v54  ;;  %1588 = vmatprep.mubr.msk.bf16.mxu0 %vm1890_vm2, %v1889_v4 }
 0x68b   :  { %1752 = vrcp.f32 %v507_v55 }
 0x68c   :  { %1754 = vrcp.f32 %v508_v56 }
 0x695   :  { %v1753_v57 = vpop.eup %1752 }
 0x696   :  { %v1755_v60 = vpop.eup %1754  ;;  %v515_v63 = vmul.f32 %v1753_v57, %v2056_v23  ;;  %v207_v23 = vadd.f32 %v2072_v38, %v2028_v16 }
 0x697   :  { %v516_v2 = vmul.f32 %v1755_v60, %v438_v26 }
 0x6f8   :  { %v520_v58 = vpop.permute.xlu0 %519 }
 0x6f9   :  { %v525_v59 = vmul.f32 %v1753_v57, %v520_v58 }
 0x6fa   :  { %v522_v61 = vpop.permute.xlu1 %521 }
 0x6fb   :  { %529 = vrot.lane.b32.xlu0 %v525_v59, %s1892_s22  ;;  %v526_v62 = vmul.f32 %v1755_v60, %v522_v61 }
 0x6fd   :  { %531 = vrot.lane.b32.xlu1 %v526_v62, %s1892_s22 }
 0x75c   :  { %v2125_v58 = vpop.f32.mrb[8].mxu0 }
 0x75d   :  { %v211_v59 = vpop.f32.mrb[9].mxu0 }
 0x76d   :  { %v530_v0 = vpop.permute.xlu0 %529 }
 0x76e   :  { %v535_v1 = vadd.f32 %v530_v0, %v515_v63  ;;  %v212_v63 = vadd.f32 %v2028_v16, %v211_v59 }
 0x76f   :  { %v532_v3 = vpop.permute.xlu1 %531 }
 0x770   :  { %1756 = vtanh.f32 %v535_v1  ;;  %v536_v6 = vadd.f32 %v532_v3, %v516_v2 }
 0x772   :  { %1758 = vtanh.f32 %v536_v6 }
 0x77a   :  { %v1757_v7 = vpop.eup %1756 }
 0x77b   :  { %541 = vrot.lane.b32.xlu0 %v1757_v7, %s1892_s22 }
 0x77c   :  { %v1759_v9 = vpop.eup %1758 }
 0x77d   :  { %543 = vrot.lane.b32.xlu1 %v1759_v9, %s1892_s22 }
 0x7ed   :  { %v542_v13 = vpop.permute.xlu0 %541 }
 0x7ee   :  { %v547_v17 = vmul.f32 %v1753_v57, %v542_v13 }
 0x7ef   :  { %v544_v15 = vpop.permute.xlu1 %543 }
 0x7f0   :  { %v548_v18 = vmul.f32 %v1755_v60, %v544_v15  ;;  %v2127_v60 = vpop.f32.mrb[10].mxu0 }
 0x7f1   :  { %v214_v61 = vpop.f32.mrb[11].mxu0 }
 0x7f2   :  { %v549_v19 = vpack.c.bf16 %v548_v18, %v547_v17 }
 0x7f4   :  { %551 = vrot.lane.b32.xlu0 %v549_v19, %s1893_s3 }
 0x866   :  { %v552_v20 = vpop.permute.xlu0 %551 }
 0x867   :  { %1581 = vmatmul.mubr.msk.bf16.vlgmr.msra.gmra.mrb[16].mxu1 %vm258_vm3, %v552_v20 }
 0x868   :  { %1593 = vmatpush3.bf16.msra.mxu1 %v1982_v5  ;;  %1596 = vmatprep.mubr.msk.bf16.mxu1 %vm1890_vm2, %v1889_v4 }
 0x869   :  { %1594 = vmatprep.subr.bf16.mxu1 %v1889_v4 }
 0x86c   :  { %1595 = vmatpush3.bf16.msra.mxu1 %v1997_v8 }
 0x86d   :  { %1608 = vmatprep.subr.bf16.mxu1 %v1889_v4 }
 0x93a   :  { %v590_v22 = vpop.f32.mrb[16].mxu1 }
 0x93b   :  { %v597_v24 = vadd.f32 %v590_v22, %v204_v21  ;;  %v1582_v25 = vpop.f32.mrb[17].mxu1 }
 0x93c   :  { %v593_v26 = vpop.f32.mrb[18].mxu1 }
 0x93d   :  { %1760 = vtanh.f32 %v597_v24  ;;  %v598_v27 = vadd.f32 %v593_v26, %v207_v23  ;;  %v1583_v28 = vpop.f32.mrb[19].mxu1  ;;  %v1455_v31 = vmul.f32 -1.442695, %v597_v24 }
 0x93f   :  { %1762 = vtanh.f32 %v598_v27  ;;  %v1456_v32 = vmul.f32 -1.442695, %v598_v27 }
 0x940   :  { %1764 = vpow2.f32 %v1455_v31 }
 0x941   :  { %1766 = vpow2.f32 %v1456_v32 }
 0x947   :  { %v1761_v29 = vpop.eup %1760 }
 0x948   :  { %617 = vrot.lane.b32.xlu1 %v1761_v29, %s1892_s22 }
 0x949   :  { %v1763_v30 = vpop.eup %1762 }
 0x94a   :  { %619 = vrot.lane.b32.xlu0 %v1763_v30, %s1892_s22  ;;  %v1765_v33 = vpop.eup %1764 }
 0x94b   :  { %v1767_v34 = vpop.eup %1766  ;;  %v605_v35 = vadd.f32 1.0, %v1765_v33 }
 0x94c   :  { %v606_v36 = vadd.f32 1.0, %v1767_v34 }
 0x94d   :  { %1768 = vrcp.f32 %v605_v35 }
 0x94e   :  { %1770 = vrcp.f32 %v606_v36 }
 0x957   :  { %v1769_v37 = vpop.eup %1768 }
 0x958   :  { %v1771_v40 = vpop.eup %1770  ;;  %v613_v43 = vmul.f32 %v1769_v37, %v535_v1  ;;  %v215_v1 = vadd.f32 %v2028_v16, %v214_v61 }
 0x959   :  { %v614_v46 = vmul.f32 %v1771_v40, %v536_v6 }
 0x9ba   :  { %v618_v38 = vpop.permute.xlu1 %617 }
 0x9bb   :  { %v623_v39 = vmul.f32 %v1769_v37, %v618_v38 }
 0x9bc   :  { %v620_v41 = vpop.permute.xlu0 %619 }
 0x9bd   :  { %627 = vrot.lane.b32.xlu1 %v623_v39, %s1892_s22  ;;  %v624_v42 = vmul.f32 %v1771_v40, %v620_v41 }
 0x9bf   :  { %629 = vrot.lane.b32.xlu0 %v624_v42, %s1892_s22 }
 0xa2f   :  { %v628_v44 = vpop.permute.xlu1 %627 }
 0xa30   :  { %v2106_v45 = vadd.f32 %v628_v44, %v613_v43  ;;  %v220_v43 = vadd.f32 %v2125_v58, %v2028_v16 }
 0xa31   :  { %v630_v47 = vpop.permute.xlu0 %629 }
 0xa32   :  { %1772 = vtanh.f32 %v2106_v45  ;;  %v2109_v48 = vadd.f32 %v630_v47, %v614_v46 }
 0xa34   :  { %1774 = vtanh.f32 %v2109_v48 }
 0xa3c   :  { %v1773_v51 = vpop.eup %1772 }
 0xa3d   :  { %639 = vrot.lane.b32.xlu1 %v1773_v51, %s1892_s22 }
 0xa3e   :  { %v1775_v52 = vpop.eup %1774 }
 0xa3f   :  { %641 = vrot.lane.b32.xlu0 %v1775_v52, %s1892_s22 }
 0xaaf   :  { %v640_v53 = vpop.permute.xlu1 %639 }
 0xab0   :  { %v645_v55 = vmul.f32 %v1769_v37, %v640_v53 }
 0xab1   :  { %v642_v54 = vpop.permute.xlu0 %641 }
 0xab2   :  { %v646_v56 = vmul.f32 %v1771_v40, %v642_v54 }
 0xab4   :  { %v647_v57 = vpack.c.bf16 %v646_v56, %v645_v55 }
 0xab6   :  { %649 = vrot.lane.b32.xlu1 %v647_v57, %s1893_s3 }
 0xb28   :  { %v650_v62 = vpop.permute.xlu1 %649 }
 0xb29   :  { %1589 = vmatmul.mubr.msk.bf16.vlgmr.msra.gmra.mrb[12].mxu0 %vm258_vm3, %v650_v62 }
 0xb2a   :  { %1601 = vmatpush3.bf16.msra.mxu0 %v1982_v5  ;;  %1604 = vmatprep.mubr.msk.bf16.mxu0 %vm1890_vm2, %v1889_v4 }
 0xb2b   :  { %1602 = vmatprep.subr.bf16.mxu0 %v1889_v4 }
 0xb2e   :  { %1603 = vmatpush3.bf16.msra.mxu0 %v1997_v8 }
 0xb2f   :  { %1616 = vmatprep.subr.bf16.mxu0 %v1889_v4 }
 0xbfc   :  { %v688_v0 = vpop.f32.mrb[12].mxu0 }
 0xbfd   :  { %v695_v2 = vadd.f32 %v688_v0, %v212_v63  ;;  %v1590_v3 = vpop.f32.mrb[13].mxu0 }
 0xbfe   :  { %v691_v6 = vpop.f32.mrb[14].mxu0 }
 0xbff   :  { %1776 = vtanh.f32 %v695_v2  ;;  %v696_v7 = vadd.f32 %v691_v6, %v215_v1  ;;  %v1591_v9 = vpop.f32.mrb[15].mxu0  ;;  %v1458_v17 = vmul.f32 -1.442695, %v695_v2 }
 0xc01   :  { %1778 = vtanh.f32 %v696_v7  ;;  %v1459_v18 = vmul.f32 -1.442695, %v696_v7 }
 0xc02   :  { %1780 = vpow2.f32 %v1458_v17 }
 0xc03   :  { %1782 = vpow2.f32 %v1459_v18 }
 0xc09   :  { %v1777_v13 = vpop.eup %1776 }
 0xc0a   :  { %715 = vrot.lane.b32.xlu0 %v1777_v13, %s1892_s22 }
 0xc0b   :  { %v1779_v15 = vpop.eup %1778 }
 0xc0c   :  { %717 = vrot.lane.b32.xlu1 %v1779_v15, %s1892_s22  ;;  %v1781_v19 = vpop.eup %1780 }
 0xc0d   :  { %v1783_v20 = vpop.eup %1782  ;;  %v703_v21 = vadd.f32 1.0, %v1781_v19 }
 0xc0e   :  { %v704_v22 = vadd.f32 1.0, %v1783_v20 }
 0xc0f   :  { %1784 = vrcp.f32 %v703_v21  ;;  %v228_v21 = vadd.f32 %v2028_v16, %v2017_v11 }
 0xc10   :  { %1786 = vrcp.f32 %v704_v22 }
 0xc19   :  { %v1785_v23 = vpop.eup %1784 }
 0xc1a   :  { %v1787_v26 = vpop.eup %1786  ;;  %v711_v29 = vmul.f32 %v1785_v23, %v2106_v45  ;;  %v223_v45 = vadd.f32 %v2127_v60, %v2028_v16 }
 0xc1b   :  { %v712_v32 = vmul.f32 %v1787_v26, %v2109_v48 }
 0xc7c   :  { %v716_v24 = vpop.permute.xlu0 %715 }
 0xc7d   :  { %v721_v25 = vmul.f32 %v1785_v23, %v716_v24 }
 0xc7e   :  { %v718_v27 = vpop.permute.xlu1 %717 }
 0xc7f   :  { %725 = vrot.lane.b32.xlu0 %v721_v25, %s1892_s22  ;;  %v722_v28 = vmul.f32 %v1787_v26, %v718_v27 }
 0xc81   :  { %727 = vrot.lane.b32.xlu1 %v722_v28, %s1892_s22 }
 0xcf1   :  { %v726_v30 = vpop.permute.xlu0 %725 }
 0xcf2   :  { %v731_v31 = vadd.f32 %v726_v30, %v711_v29 }
 0xcf3   :  { %v728_v33 = vpop.permute.xlu1 %727 }
 0xcf4   :  { %1788 = vtanh.f32 %v731_v31  ;;  %v732_v34 = vadd.f32 %v728_v33, %v712_v32 }
 0xcf6   :  { %1790 = vtanh.f32 %v732_v34 }
 0xcfe   :  { %v1789_v35 = vpop.eup %1788 }
 0xcff   :  { %737 = vrot.lane.b32.xlu0 %v1789_v35, %s1892_s22 }
 0xd00   :  { %v1791_v36 = vpop.eup %1790 }
 0xd01   :  { %739 = vrot.lane.b32.xlu1 %v1791_v36, %s1892_s22 }
 0xd71   :  { %v738_v37 = vpop.permute.xlu0 %737 }
 0xd72   :  { %v743_v39 = vmul.f32 %v1785_v23, %v738_v37  ;;  %v231_v23 = vadd.f32 %v2028_v16, %v2023_v14 }
 0xd73   :  { %v740_v38 = vpop.permute.xlu1 %739 }
 0xd74   :  { %v744_v40 = vmul.f32 %v1787_v26, %v740_v38 }
 0xd76   :  { %v745_v41 = vpack.c.bf16 %v744_v40, %v743_v39 }
 0xd78   :  { %747 = vrot.lane.b32.xlu0 %v745_v41, %s1893_s3 }
 0xdea   :  { %v748_v42 = vpop.permute.xlu0 %747 }
 0xdeb   :  { %1597 = vmatmul.mubr.msk.bf16.vlgmr.msra.gmra.mrb[20].mxu1 %vm258_vm3, %v748_v42 }
 0xdec   :  { %1609 = vmatpush3.bf16.msra.mxu1 %v1982_v5  ;;  %1612 = vmatprep.mubr.msk.bf16.mxu1 %vm1890_vm2, %v1889_v4 }
 0xded   :  { %1610 = vmatprep.subr.bf16.mxu1 %v1889_v4 }
 0xdf0   :  { %1611 = vmatpush3.bf16.msra.mxu1 %v1997_v8 }
 0xdf1   :  { %1624 = vmatprep.subr.bf16.mxu1 %v1889_v4 }
 0xebe   :  { %v786_v44 = vpop.f32.mrb[20].mxu1 }
 0xebf   :  { %v793_v46 = vadd.f32 %v786_v44, %v220_v43  ;;  %v1598_v47 = vpop.f32.mrb[21].mxu1 }
 0xec0   :  { %v789_v48 = vpop.f32.mrb[22].mxu1 }
 0xec1   :  { %1792 = vtanh.f32 %v793_v46  ;;  %v794_v5 = vadd.f32 %v789_v48, %v223_v45  ;;  %v1599_v49 = vpop.f32.mrb[23].mxu1  ;;  %v1461_v51 = vmul.f32 -1.442695, %v793_v46 }
 0xec3   :  { %1794 = vtanh.f32 %v794_v5  ;;  %v1462_v52 = vmul.f32 -1.442695, %v794_v5 }
 0xec4   :  { %1796 = vpow2.f32 %v1461_v51 }
 0xec5   :  { %1798 = vpow2.f32 %v1462_v52 }
 0xecb   :  { %v1793_v50 = vpop.eup %1792 }
 0xecc   :  { %813 = vrot.lane.b32.xlu1 %v1793_v50, %s1892_s22 }
 0xecd   :  { %v1795_v8 = vpop.eup %1794 }
 0xece   :  { %815 = vrot.lane.b32.xlu0 %v1795_v8, %s1892_s22  ;;  %v1797_v53 = vpop.eup %1796 }
 0xecf   :  { %v1799_v54 = vpop.eup %1798  ;;  %v801_v55 = vadd.f32 1.0, %v1797_v53  ;;  %v236_v53 = vadd.f32 %v2015_v10, %v2028_v16 }
 0xed0   :  { %v802_v56 = vadd.f32 1.0, %v1799_v54 }
 0xed1   :  { %1800 = vrcp.f32 %v801_v55  ;;  %v239_v55 = vadd.f32 %v2019_v12, %v2028_v16 }
 0xed2   :  { %1802 = vrcp.f32 %v802_v56 }
 0xedb   :  { %v1801_v57 = vpop.eup %1800 }
 0xedc   :  { %v1803_v60 = vpop.eup %1802  ;;  %v809_v63 = vmul.f32 %v1801_v57, %v731_v31 }
 0xedd   :  { %v810_v2 = vmul.f32 %v1803_v60, %v732_v34 }
 0xf3e   :  { %v814_v58 = vpop.permute.xlu1 %813 }
 0xf3f   :  { %v819_v59 = vmul.f32 %v1801_v57, %v814_v58 }
 0xf40   :  { %v816_v61 = vpop.permute.xlu0 %815 }
 0xf41   :  { %823 = vrot.lane.b32.xlu1 %v819_v59, %s1892_s22  ;;  %v820_v62 = vmul.f32 %v1803_v60, %v816_v61 }
 0xf43   :  { %825 = vrot.lane.b32.xlu0 %v820_v62, %s1892_s22 }
 0xfb3   :  { %v824_v0 = vpop.permute.xlu1 %823 }
 0xfb4   :  { %v829_v1 = vadd.f32 %v824_v0, %v809_v63 }
 0xfb5   :  { %v826_v3 = vpop.permute.xlu0 %825 }
 0xfb6   :  { %1804 = vtanh.f32 %v829_v1  ;;  %v830_v6 = vadd.f32 %v826_v3, %v810_v2 }
 0xfb8   :  { %1806 = vtanh.f32 %v830_v6 }
 0xfc0   :  { %v1805_v7 = vpop.eup %1804 }
 0xfc1   :  { %835 = vrot.lane.b32.xlu1 %v1805_v7, %s1892_s22 }
 0xfc2   :  { %v1807_v9 = vpop.eup %1806 }
 0xfc3   :  { %837 = vrot.lane.b32.xlu0 %v1807_v9, %s1892_s22 }
0x1033   :  { %v836_v13 = vpop.permute.xlu1 %835 }
0x1034   :  { %v841_v17 = vmul.f32 %v1801_v57, %v836_v13 }
0x1035   :  { %v838_v15 = vpop.permute.xlu0 %837 }
0x1036   :  { %v842_v18 = vmul.f32 %v1803_v60, %v838_v15 }
0x1038   :  { %v843_v19 = vpack.c.bf16 %v842_v18, %v841_v17 }
0x103a   :  { %845 = vrot.lane.b32.xlu1 %v843_v19, %s1893_s3 }
0x10ac   :  { %v846_v20 = vpop.permute.xlu1 %845 }
0x10ad   :  { %1605 = vmatmul.mubr.msk.bf16.vlgmr.msra.gmra.mrb[16].mxu0 %vm258_vm3, %v846_v20 }
0x10ae   :  { %1620 = vmatprep.mubr.msk.bf16.mxu0 %vm1890_vm2, %v1889_v4 }
0x1180   :  { %v884_v22 = vpop.f32.mrb[16].mxu0 }
0x1181   :  { %v891_v24 = vadd.f32 %v884_v22, %v228_v21  ;;  %v1606_v25 = vpop.f32.mrb[17].mxu0  ;;  %v1705_v22 = vld [vmem:[%s2266_s4] sm:$0xff]  }
0x1182   :  { %v887_v26 = vpop.f32.mrb[18].mxu0  ;;  %1617 = vmatpush3.bf16.msra.mxu0 %v1705_v22 }
0x1183   :  { %1808 = vtanh.f32 %v891_v24  ;;  %v892_v27 = vadd.f32 %v887_v26, %v231_v23  ;;  %v1607_v28 = vpop.f32.mrb[19].mxu0  ;;  %v1464_v31 = vmul.f32 -1.442695, %v891_v24  ;;  %v1706_v23 = vld [vmem:[%s2266_s4 + $0x8] sm:$0xff]   ;;  %1618 = vmatprep.subr.bf16.mxu0 %v1889_v4 }
0x1185   :  { %1810 = vtanh.f32 %v892_v27  ;;  %v1465_v32 = vmul.f32 -1.442695, %v892_v27 }
0x1186   :  { %1812 = vpow2.f32 %v1464_v31  ;;  %1619 = vmatpush3.bf16.msra.mxu0 %v1706_v23 }
0x1187   :  { %1814 = vpow2.f32 %v1465_v32  ;;  %1632 = vmatprep.subr.bf16.mxu0 %v1889_v4  ;;  %v1707_v32 = vld [vmem:[%s2269_s7] sm:$0xff]  }
0x118d   :  { %v1809_v29 = vpop.eup %1808 }
0x118e   :  { %911 = vrot.lane.b32.xlu0 %v1809_v29, %s1892_s22 }
0x118f   :  { %v1811_v30 = vpop.eup %1810 }
0x1190   :  { %913 = vrot.lane.b32.xlu1 %v1811_v30, %s1892_s22  ;;  %v1813_v11 = vpop.eup %1812 }
0x1191   :  { %v1815_v33 = vpop.eup %1814  ;;  %v899_v14 = vadd.f32 1.0, %v1813_v11  ;;  %v1708_v11 = vld [vmem:[%s2269_s7 + $0x8] sm:$0xff]  }
0x1192   :  { %v900_v34 = vadd.f32 1.0, %v1815_v33  ;;  %v1469_v33 = vld [vmem:[%s2267_s5] ss:$0 sm:$0xff]  ;;  %s1894_s5 = smov 96  }
0x1193   :  { %1816 = vrcp.f32 %v899_v14 }
0x1194   :  { %1818 = vrcp.f32 %v900_v34 }
0x119d   :  { %v1817_v35 = vpop.eup %1816 }
0x119e   :  { %v1819_v38 = vpop.eup %1818  ;;  %v907_v41 = vmul.f32 %v1817_v35, %v829_v1 }
0x119f   :  { %v908_v44 = vmul.f32 %v1819_v38, %v830_v6 }
0x1200   :  { %v912_v36 = vpop.permute.xlu0 %911 }
0x1201   :  { %v917_v37 = vmul.f32 %v1817_v35, %v912_v36 }
0x1202   :  { %v914_v39 = vpop.permute.xlu1 %913 }
0x1203   :  { %921 = vrot.lane.b32.xlu0 %v917_v37, %s1892_s22  ;;  %v918_v40 = vmul.f32 %v1819_v38, %v914_v39 }
0x1205   :  { %923 = vrot.lane.b32.xlu1 %v918_v40, %s1892_s22 }
0x1275   :  { %v922_v42 = vpop.permute.xlu0 %921 }
0x1276   :  { %v927_v43 = vadd.f32 %v922_v42, %v907_v41 }
0x1277   :  { %v924_v45 = vpop.permute.xlu1 %923 }
0x1278   :  { %1820 = vtanh.f32 %v927_v43  ;;  %v928_v46 = vadd.f32 %v924_v45, %v908_v44 }
0x127a   :  { %1822 = vtanh.f32 %v928_v46 }
0x1282   :  { %v1821_v47 = vpop.eup %1820 }
0x1283   :  { %933 = vrot.lane.b32.xlu0 %v1821_v47, %s1892_s22 }
0x1284   :  { %v1823_v48 = vpop.eup %1822 }
0x1285   :  { %935 = vrot.lane.b32.xlu1 %v1823_v48, %s1892_s22 }
0x12f5   :  { %v934_v5 = vpop.permute.xlu0 %933 }
0x12f6   :  { %v939_v50 = vmul.f32 %v1817_v35, %v934_v5 }
0x12f7   :  { %v936_v49 = vpop.permute.xlu1 %935 }
0x12f8   :  { %v940_v8 = vmul.f32 %v1819_v38, %v936_v49 }
0x12fa   :  { %v941_v51 = vpack.c.bf16 %v940_v8, %v939_v50 }
0x12fc   :  { %943 = vrot.lane.b32.xlu0 %v941_v51, %s1893_s3 }
0x136e   :  { %v944_v52 = vpop.permute.xlu0 %943 }
0x136f   :  { %1613 = vmatmul.mubr.msk.bf16.vlgmr.msra.gmra.mrb[24].mxu1 %vm258_vm3, %v944_v52 }
0x1370   :  { %1628 = vmatprep.mubr.msk.bf16.mxu1 %vm1890_vm2, %v1889_v4  ;;  %1625 = vmatpush3.bf16.msra.mxu1 %v1707_v32 }
0x1371   :  { %1626 = vmatprep.subr.bf16.mxu1 %v1889_v4 }
0x1374   :  { %1627 = vmatpush3.bf16.msra.mxu1 %v1708_v11 }
0x1375   :  { %1642 = vmatprep.subr.bf16.mxu1 %v1889_v4 }
0x1442   :  { %v982_v54 = vpop.f32.mrb[24].mxu1 }
0x1443   :  { %v989_v56 = vadd.f32 %v982_v54, %v236_v53  ;;  %v1614_v57 = vpop.f32.mrb[25].mxu1 }
0x1444   :  { %v985_v58 = vpop.f32.mrb[26].mxu1  ;;  %v1711_v57 = vld [vmem:[%s2271_s9 + $0x8] sm:$0xff]  }
0x1445   :  { %1824 = vtanh.f32 %v989_v56  ;;  %v990_v59 = vadd.f32 %v985_v58, %v239_v55  ;;  %v1615_v60 = vpop.f32.mrb[27].mxu1  ;;  %v1467_v63 = vmul.f32 -1.442695, %v989_v56  ;;  %v1709_v55 = vld [vmem:[%s2268_s6] sm:$0xff]  }
0x1446   :  { %v1710_v56 = vld [vmem:[%s2271_s9] sm:$0xff]  }
0x1447   :  { %1826 = vtanh.f32 %v990_v59  ;;  %v1468_v0 = vmul.f32 -1.442695, %v990_v59  ;;  %v1476_v58 = vld [vmem:[%s2270_s8] ss:$0 sm:$0xff]  ;;  %s1895_s8 = smov 112  }
0x1448   :  { %1828 = vpow2.f32 %v1467_v63 }
0x1449   :  { %1830 = vpow2.f32 %v1468_v0 }
0x144f   :  { %v1825_v61 = vpop.eup %1824 }
0x1450   :  { %1009 = vrot.lane.b32.xlu1 %v1825_v61, %s1892_s22 }
0x1451   :  { %v1827_v62 = vpop.eup %1826 }
0x1452   :  { %1011 = vrot.lane.b32.xlu0 %v1827_v62, %s1892_s22  ;;  %v1829_v10 = vpop.eup %1828 }
0x1453   :  { %v1831_v1 = vpop.eup %1830  ;;  %v997_v12 = vadd.f32 1.0, %v1829_v10 }
0x1454   :  { %v998_v16 = vadd.f32 1.0, %v1831_v1 }
0x1455   :  { %1832 = vrcp.f32 %v997_v12 }
0x1456   :  { %1834 = vrcp.f32 %v998_v16 }
0x145f   :  { %v1833_v2 = vpop.eup %1832 }
0x1460   :  { %v1835_v7 = vpop.eup %1834  ;;  %v1005_v15 = vmul.f32 %v1833_v2, %v927_v43 }
0x1461   :  { %v1006_v19 = vmul.f32 %v1835_v7, %v928_v46 }
0x14c2   :  { %v1010_v3 = vpop.permute.xlu1 %1009 }
0x14c3   :  { %v1015_v6 = vmul.f32 %v1833_v2, %v1010_v3 }
0x14c4   :  { %v1012_v9 = vpop.permute.xlu0 %1011 }
0x14c5   :  { %1019 = vrot.lane.b32.xlu1 %v1015_v6, %s1892_s22  ;;  %v1016_v13 = vmul.f32 %v1835_v7, %v1012_v9 }
0x14c7   :  { %1021 = vrot.lane.b32.xlu0 %v1016_v13, %s1892_s22 }
0x1537   :  { %v1020_v17 = vpop.permute.xlu1 %1019 }
0x1538   :  { %v1025_v18 = vadd.f32 %v1020_v17, %v1005_v15 }
0x1539   :  { %v1022_v20 = vpop.permute.xlu0 %1021 }
0x153a   :  { %1836 = vtanh.f32 %v1025_v18  ;;  %v1026_v21 = vadd.f32 %v1022_v20, %v1006_v19 }
0x153c   :  { %1838 = vtanh.f32 %v1026_v21 }
0x1544   :  { %v1837_v24 = vpop.eup %1836 }
0x1545   :  { %1031 = vrot.lane.b32.xlu1 %v1837_v24, %s1892_s22 }
0x1546   :  { %v1839_v25 = vpop.eup %1838 }
0x1547   :  { %1033 = vrot.lane.b32.xlu0 %v1839_v25, %s1892_s22 }
0x15b7   :  { %v1032_v26 = vpop.permute.xlu1 %1031 }
0x15b8   :  { %v1037_v28 = vmul.f32 %v1833_v2, %v1032_v26 }
0x15b9   :  { %v1034_v27 = vpop.permute.xlu0 %1033 }
0x15ba   :  { %v1038_v29 = vmul.f32 %v1835_v7, %v1034_v27 }
0x15bc   :  { %v1039_v30 = vpack.c.bf16 %v1038_v29, %v1037_v28  ;;  %v1482_v28 = vld [vmem:[%s2272_s10] ss:$0 sm:$0xff] }
0x15be   :  { %1052 = vrot.lane.b32.xlu1 %v1039_v30, %s1893_s3 }
0x1630   :  { %v1053_v31 = vpop.permute.xlu1 %1052 }
0x1631   :  { %1621 = vmatmul.mubr.msk.bf16.vlgmr.msra.gmra.mrb[20].mxu0 %vm258_vm3, %v1053_v31 }
0x1632   :  { %1638 = vmatprep.mubr.msk.bf16.mxu0 %vm1890_vm2, %v1889_v4 }
0x1704   :  { %v1103_v14 = vpop.f32.mrb[20].mxu0 }
0x1705   :  { %v1622_v34 = vpop.f32.mrb[21].mxu0  ;;  %v1104_v36 = vadd.f32 %v1469_v33, %v1103_v14 }
0x1706   :  { %v1106_v35 = vpop.f32.mrb[22].mxu0 }
0x1707   :  { %v1107_v37 = vadd.f32 %v1469_v33, %v1106_v35  ;;  %v1623_v38 = vpop.f32.mrb[23].mxu0 }
0x1709   :  { %v1112_v39 = vpack.c.bf16 %v1107_v37, %v1104_v36 }
0x170b   :  { %1629 = vmatmul.mubr.msk.bf16.vlgmr.msra.gmra.mrb[28].mxu1 %vm258_vm3, %v1112_v39 }
0x170c   :  { %1646 = vmatprep.mubr.msk.bf16.mxu1 %vm1890_vm2, %v1889_v4  ;;  %1643 = vmatpush3.bf16.msra.mxu1 %v1710_v56 }
0x170d   :  { %1644 = vmatprep.subr.bf16.mxu1 %v1889_v4 }
0x1710   :  { %1645 = vmatpush3.bf16.msra.mxu1 %v1711_v57 }
0x17de   :  { %v1166_v40 = vpop.f32.mrb[28].mxu1 }
0x17df   :  { %v1630_v41 = vpop.f32.mrb[29].mxu1  ;;  %v1197_v59 = vadd.f32 %v1476_v58, %v1166_v40 }
0x17e0   :  { %v1169_v42 = vpop.f32.mrb[30].mxu1 }
0x17e1   :  { %v1631_v43 = vpop.f32.mrb[31].mxu1  ;;  %v1680_v44 = vpack.i.bf16 %v1169_v42, %v1166_v40  ;;  %v1187_v45 = vpack.c.bf16 %v1169_v42, %v1166_v40  ;;  %v1198_v63 = vadd.f32 %v1476_v58, %v1169_v42 }
0x17e3   :  { %1681 = vrot.lane.b32.xlu1 %v1680_v44, %s1893_s3  ;;  %1676 = vrot.lane.b32.xlu0 %v1680_v44, %s1894_s5 }
0x17e7   :  { %1207 = vrot.lane.b32.xlu0 %v1187_v45, %s1894_s5 }
0x1855   :  { %v1682_v46 = vpop.permute.xlu1 %1681  ;;  %v1677_v47 = vpop.permute.xlu0 %1676 }
0x1856   :  { %v1684_v48 = vunpack.i.h.bf16 %v1682_v46  ;;  %v1683_v5 = vunpack.i.l.bf16 %v1682_v46  ;;  %v1679_v49 = vunpack.i.h.bf16 %v1677_v47  ;;  %v1678_v50 = vunpack.i.l.bf16 %v1677_v47 }
0x1858   :  { %v1189_v8 = vpack.c.bf16 %v1684_v48, %v1683_v5  ;;  %v1188_v51 = vpack.c.bf16 %v1679_v49, %v1678_v50 }
0x1859   :  { %v1208_v52 = vpop.permute.xlu0 %1207 }
0x185a   :  { %1209 = vrot.lane.b32.xlu1 %v1188_v51, %s1894_s5  ;;  %1211 = vrot.lane.b32.xlu0 %v1189_v8, %s1894_s5 }
0x185b   :  { %1633 = vmatpush3.bf16.msra.mxu0 %v1208_v52 }
0x185c   :  { %1634 = vmatprep.subr.bf16.mxu0 %v1889_v4 }
0x18cc   :  { %v1210_v53 = vpop.permute.xlu1 %1209  ;;  %v1212_v54 = vpop.permute.xlu0 %1211 }
0x18cd   :  { %1635 = vmatpush3.bf16.msra.mxu0 %v1210_v53 }
0x18ce   :  { %1636 = vmatprep.subr.bf16.mxu0 %v1889_v4 }
0x18d1   :  { %1637 = vmatpush3.bf16.msra.mxu0 %v1212_v54 }
0x18d2   :  { %1650 = vmatprep.subr.bf16.mxu0 %v1889_v4 }
0x18d4   :  { %1639 = vmatmul.mubr.msk.bf16.vlgmr.msra.gmra.mrb[24].mxu0 %vm1216_vm4, %v1709_v55 }
0x18d5   :  { %1656 = vmatprep.mubr.msk.bf16.mxu0 %vm1890_vm2, %v1889_v4 }
0x19a7   :  { %v1254_v60 = vpop.f32.mrb[24].mxu0 }
0x19a8   :  { %v1261_v61 = vadd.f32 %v1254_v60, %v1197_v59  ;;  %v1640_v62 = vpop.f32.mrb[25].mxu0 }
0x19a9   :  { %v1257_v0 = vpop.f32.mrb[26].mxu0 }
0x19aa   :  { %v1262_v10 = vadd.f32 %v1257_v0, %v1198_v63  ;;  %v1641_v1 = vpop.f32.mrb[27].mxu0  ;;  %v1263_v12 = vmax.f32 %v1261_v61, 0.0 }
0x19ac   :  { %v1264_v16 = vmax.f32 %v1262_v10, 0.0 }
0x19ae   :  { %v1265_v2 = vpack.c.bf16 %v1264_v16, %v1263_v12 }
0x19b0   :  { %1647 = vmatmul.mubr.msk.bf16.vlgmr.msra.gmra.mrb[32].mxu1 %vm258_vm3, %v1265_v2 }
0x1a83   :  { %v1319_v3 = vpop.f32.mrb[32].mxu1 }
0x1a84   :  { %v1648_v6 = vpop.f32.mrb[33].mxu1  ;;  %v1350_v29 = vadd.f32 %v1482_v28, %v1319_v3 }
0x1a85   :  { %v1322_v7 = vpop.f32.mrb[34].mxu1 }
0x1a86   :  { %v1649_v9 = vpop.f32.mrb[35].mxu1  ;;  %v1690_v13 = vpack.i.bf16 %v1322_v7, %v1319_v3  ;;  %v1340_v15 = vpack.c.bf16 %v1322_v7, %v1319_v3  ;;  %v1351_v11 = vadd.f32 %v1482_v28, %v1322_v7 }
0x1a88   :  { %1691 = vrot.lane.b32.xlu0 %v1690_v13, %s1894_s5  ;;  %1686 = vrot.lane.b32.xlu1 %v1690_v13, %s1895_s8 }
0x1a8c   :  { %1355 = vrot.lane.b32.xlu1 %v1340_v15, %s1895_s8 }
0x1afa   :  { %v1692_v17 = vpop.permute.xlu0 %1691  ;;  %v1687_v18 = vpop.permute.xlu1 %1686 }
0x1afb   :  { %v1694_v19 = vunpack.i.h.bf16 %v1692_v17  ;;  %v1693_v20 = vunpack.i.l.bf16 %v1692_v17  ;;  %v1689_v21 = vunpack.i.h.bf16 %v1687_v18  ;;  %v1688_v22 = vunpack.i.l.bf16 %v1687_v18 }
0x1afd   :  { %v1342_v23 = vpack.c.bf16 %v1694_v19, %v1693_v20  ;;  %v1341_v24 = vpack.c.bf16 %v1689_v21, %v1688_v22 }
0x1afe   :  { %v1356_v25 = vpop.permute.xlu1 %1355 }
0x1aff   :  { %1357 = vrot.lane.b32.xlu0 %v1341_v24, %s1895_s8  ;;  %1359 = vrot.lane.b32.xlu1 %v1342_v23, %s1895_s8 }
0x1b00   :  { %1651 = vmatpush3.bf16.msra.mxu0 %v1356_v25 }
0x1b01   :  { %1652 = vmatprep.subr.bf16.mxu0 %v1889_v4 }
0x1b71   :  { %v1358_v26 = vpop.permute.xlu0 %1357  ;;  %v1360_v27 = vpop.permute.xlu1 %1359 }
0x1b72   :  { %1653 = vmatpush3.bf16.msra.mxu0 %v1358_v26 }
0x1b73   :  { %1654 = vmatprep.subr.bf16.mxu0 %v1889_v4 }
0x1b76   :  { %1655 = vmatpush3.bf16.msra.mxu0 %v1360_v27 }
0x1b79   :  { %1657 = vmatmul.mubr.msk.bf16.vlgmr.msra.gmra.mrb[28].mxu0 %vm1216_vm4, %v1709_v55 }
0x1c4c   :  { %v1398_v30 = vpop.f32.mrb[28].mxu0 }
0x1c4d   :  { %v1405_v31 = vadd.f32 %v1398_v30, %v1350_v29  ;;  %v1658_v32 = vpop.f32.mrb[29].mxu0 }
0x1c4e   :  { %v1401_v33 = vpop.f32.mrb[30].mxu0 }
0x1c4f   :  { %1408 = vst.msk [vmem:[#allocation5] sm:$0xff] %vm1407_vm5, %v1405_v31  ;;  %v1406_v14 = vadd.f32 %v1401_v33, %v1351_v11  ;;  %v1659_v4 = vpop.f32.mrb[31].mxu0 }
0x1c51   :  { %1409 = vst.msk [vmem:[#allocation5 + $0x8] sm:$0xff] %vm1407_vm5, %v1406_v14 }
0x1c52   :  { %1873 = shalt.err (!%p1870_p12)
}
0x1c53   :  { %s1874_s28 = scalar_lea.hbm %s2273_s11, 256 }
0x1c54   :  { %p1875_p13 = scmp.ne.s32.totalorder %s2273_s11, %s1874_s28  ;;  %p1878_p0 = scmp.lt.u32.totalorder %s1874_s28, %s2273_s11 }
0x1c56   :  { %p1880_p1 = pnand %p1878_p0, %p1875_p13 }
0x1c58   :  { %1883 = shalt.err (!%p1880_p1)
}
0x1c59   :  { %s1897_s13 = smov 128   ;;  %s1898_s1 = smov 8  }
0x1c5a   :  { %1421 = dma.vmem_to_hbm [thread:$0]  %s1416_s25, 256, %s2273_s11, [#allocation4], %s1897_s13, %s1897_s13, %s1898_s1  }
0x1c5b   :  { %1886 = dma.done.wait [#allocation4], 256  }
0x1c5c   :  { %1887 = vsyncadd [#allocation4], 4294967040 }
0x1c5d   :  { %1425 = vsyncpa [#allocation3], 1 }
0x1c5e   :  { %1426 = vsyncpa [#allocation4], 1 }

</bundles_post_ra>
